<compile_context>
chip_gen: v6e
topology: v6e:2x2x1
jax: 0.10.0
libtpu: 0.0.40
codegen_flags: <defaults>
</compile_context>

<pallas_src>
import functools

import jax
import jax.numpy as jnp
from jax.experimental import pallas as pl
from jax.experimental.pallas import tpu as pltpu


def _round_up(x, m):
    return ((x + m - 1) // m) * m


def mnist_linear_kernel(x_ref, w1_ref, b1_ref, w2_ref, b2_ref, o_ref):
    # ---- layer 1: x @ W1 (bf16 operands, f32 accumulate) + b1, ReLU (f32) ----
    h = jnp.dot(x_ref[...], w1_ref[...], preferred_element_type=jnp.float32)
    h = jnp.maximum(h + b1_ref[...], 0.0)

    # ---- layer 2: h @ W2 (bf16 operands, f32 accumulate) + b2 ----
    logits = jnp.dot(h.astype(w2_ref.dtype), w2_ref[...],
                     preferred_element_type=jnp.float32) + b2_ref[...]
    # Padded classes carry b2 == -1e30 -> exp(logit - m) underflows to exactly 0,
    # so they contribute no probability mass.

    # ---- numerically stable softmax over the (padded, lane-dense) class axis ----
    m = jnp.max(logits, axis=-1, keepdims=True)
    e = jnp.exp(logits - m)
    denom = jnp.sum(e, axis=-1, keepdims=True)
    inv = pl.reciprocal(denom, approx=True)
    o_ref[...] = (e * inv).astype(o_ref.dtype)


@functools.partial(jax.jit, static_argnames=("tb",))
def mnist_linear_forward(x, w1, b1, w2, b2, *, tb=256):
    """x: [B, IN] f32; w1: [IN, H] f32; b1: [1, H] f32; w2: [H, OUT] f32; b2: [1, OUT] f32."""
    B, IN = x.shape
    H = w1.shape[1]
    OUT = w2.shape[1]

    compute_dtype = jnp.bfloat16          # MXU operand dtype (f32 accumulation in-kernel)
    IN_P = _round_up(IN, 128)             # 784 -> 896
    OUT_P = _round_up(OUT, 128)           # 10  -> 128
    B_P = _round_up(B, tb)                # pad batch to a multiple of the tile

    # Zero-pad inputs / weights; pad b2 with a huge negative so padded classes vanish
    # under softmax.
    x_p = jnp.zeros((B_P, IN_P), compute_dtype).at[:B, :IN].set(x.astype(compute_dtype))
    w1_p = jnp.zeros((IN_P, H), compute_dtype).at[:IN, :].set(w1.astype(compute_dtype))
    b1_p = b1.astype(jnp.float32)
    w2_p = jnp.zeros((H, OUT_P), compute_dtype).at[:, :OUT].set(w2.astype(compute_dtype))
    b2_p = jnp.full((1, OUT_P), -1e30, jnp.float32).at[:, :OUT].set(b2.astype(jnp.float32))

    grid = (B_P // tb,)

    out_p = pl.pallas_call(
        mnist_linear_kernel,
        out_shape=jax.ShapeDtypeStruct((B_P, OUT_P), jnp.float32),
        grid=grid,
        in_specs=[
            pl.BlockSpec((tb, IN_P), lambda i: (i, 0)),     # x: streams per batch tile
            pl.BlockSpec((IN_P, H), lambda i: (0, 0)),      # W1: resident (constant block)
            pl.BlockSpec((1, H), lambda i: (0, 0)),         # b1: resident
            pl.BlockSpec((H, OUT_P), lambda i: (0, 0)),     # W2: resident
            pl.BlockSpec((1, OUT_P), lambda i: (0, 0)),     # b2: resident
        ],
        out_specs=pl.BlockSpec((tb, OUT_P), lambda i: (i, 0)),
        compiler_params=pltpu.CompilerParams(
            dimension_semantics=("parallel",),              # batch tiles are independent
        ),
    )(x_p, w1_p, b1_p, w2_p, b2_p)

    return out_p[:B, :OUT]


def init_params(key, input_size=784, hidden_size=256, output_size=10):
    """Deterministic init mimicking nn.Linear's U(-1/sqrt(fan_in), 1/sqrt(fan_in))."""
    k1, k2, k3, k4 = jax.random.split(key, 4)
    bound1 = 1.0 / jnp.sqrt(jnp.float32(input_size))
    bound2 = 1.0 / jnp.sqrt(jnp.float32(hidden_size))
    # stored as [in, out] (transpose of PyTorch's [out, in]); biases as [1, out]
    w1 = jax.random.uniform(k1, (input_size, hidden_size), jnp.float32, -bound1, bound1)
    b1 = jax.random.uniform(k2, (1, hidden_size), jnp.float32, -bound1, bound1)
    w2 = jax.random.uniform(k3, (hidden_size, output_size), jnp.float32, -bound2, bound2)
    b2 = jax.random.uniform(k4, (1, output_size), jnp.float32, -bound2, bound2)
    return w1, b1, w2, b2


def reference_forward(x, w1, b1, w2, b2):
    h = jnp.maximum(x @ w1 + b1, 0.0)
    logits = h @ w2 + b2
    return jax.nn.softmax(logits, axis=-1)


if __name__ == "__main__":
    key = jax.random.PRNGKey(0)
    kx, kp = jax.random.split(key)

    batch, input_size, hidden_size, output_size = 8, 784, 256, 10
    w1, b1, w2, b2 = init_params(kp, input_size, hidden_size, output_size)

    # --- small demo batch (single grid step) ---
    x = jax.random.normal(kx, (batch, input_size), jnp.float32)
    out = jax.block_until_ready(mnist_linear_forward(x, w1, b1, w2, b2))
    ref = reference_forward(x, w1, b1, w2, b2)
    assert out.shape == (batch, output_size)
    # bf16 MXU operands -> compare against the f32 reference with a loosened tolerance.
    assert jnp.allclose(out, ref, atol=2e-2, rtol=0), "mismatch vs JAX reference (small batch)"
    assert jnp.allclose(jnp.sum(out, axis=-1), 1.0, atol=5e-3), "softmax rows must sum to 1"

    # --- non-multiple-of-tile batch (exercises batch padding + multi-tile grid) ---
    x2 = jax.random.normal(jax.random.PRNGKey(1), (300, input_size), jnp.float32)
    out2 = jax.block_until_ready(mnist_linear_forward(x2, w1, b1, w2, b2))
    ref2 = reference_forward(x2, w1, b1, w2, b2)
    assert out2.shape == (300, output_size)
    assert jnp.allclose(out2, ref2, atol=2e-2, rtol=0), "mismatch vs JAX reference (multi-tile)"
    assert jnp.allclose(jnp.sum(out2, axis=-1), 1.0, atol=5e-3), "softmax rows must sum to 1"

    print("KERNEL_OK")
</pallas_src>

<mosaic_0001>
module attributes {stable_mosaic.version = 11 : i64} {
  func.func @mnist_linear_kernel(%arg0: i32, %arg1: memref<256x896xbf16, #tpu.memory_space<vmem>>, %arg2: memref<896x256xbf16, #tpu.memory_space<vmem>>, %arg3: memref<1x256xf32, #tpu.memory_space<vmem>>, %arg4: memref<256x128xbf16, #tpu.memory_space<vmem>>, %arg5: memref<1x128xf32, #tpu.memory_space<vmem>>, %arg6: memref<256x128xf32, #tpu.memory_space<vmem>>) attributes {dimension_semantics = [#tpu.dimension_semantics<parallel>], iteration_bounds = array<i64: 1>, scalar_prefetch = 0 : i64, scratch_operands = 0 : i64, tpu.core_type = #tpu.core_type<tc>, window_params = [{transform_indices = @transform_0, window_bounds = array<i64: 256, 896>}, {pipeline_mode = #tpu.pipeline_mode<synchronous>, transform_indices = @transform_1, window_bounds = array<i64: 896, 256>}, {pipeline_mode = #tpu.pipeline_mode<synchronous>, transform_indices = @transform_2, window_bounds = array<i64: 1, 256>}, {pipeline_mode = #tpu.pipeline_mode<synchronous>, transform_indices = @transform_3, window_bounds = array<i64: 256, 128>}, {pipeline_mode = #tpu.pipeline_mode<synchronous>, transform_indices = @transform_4, window_bounds = array<i64: 1, 128>}, {transform_indices = @transform_5, window_bounds = array<i64: 256, 128>}]} {
    %c0 = arith.constant 0 : index
    %c0_0 = arith.constant 0 : index
    %0 = vector.load %arg1[%c0, %c0_0] : memref<256x896xbf16, #tpu.memory_space<vmem>>, vector<256x896xbf16>
    %c0_1 = arith.constant 0 : index
    %c0_2 = arith.constant 0 : index
    %1 = vector.load %arg2[%c0_1, %c0_2] : memref<896x256xbf16, #tpu.memory_space<vmem>>, vector<896x256xbf16>
    %cst = arith.constant dense<0.000000e+00> : vector<256x256xf32>
    %2 = tpu.matmul %0, %1, %cst {dimension_numbers = #tpu.dot_dimension_numbers<[1], [0], [0], [1], [0, 0, 1, 1], [], []>} : vector<256x896xbf16>, vector<896x256xbf16>, vector<256x256xf32> -> vector<256x256xf32>
    %c0_3 = arith.constant 0 : index
    %c0_4 = arith.constant 0 : index
    %3 = vector.load %arg3[%c0_3, %c0_4] : memref<1x256xf32, #tpu.memory_space<vmem>>, vector<1x256xf32>
    %4 = vector.broadcast %3 : vector<1x256xf32> to vector<256x256xf32>
    %5 = arith.addf %2, %4 : vector<256x256xf32>
    %cst_5 = arith.constant 0.000000e+00 : f32
    %6 = vector.broadcast %cst_5 : f32 to vector<256x256xf32>
    %7 = arith.maximumf %5, %6 : vector<256x256xf32>
    %8 = arith.truncf %7 : vector<256x256xf32> to vector<256x256xbf16>
    %c0_6 = arith.constant 0 : index
    %c0_7 = arith.constant 0 : index
    %9 = vector.load %arg4[%c0_6, %c0_7] : memref<256x128xbf16, #tpu.memory_space<vmem>>, vector<256x128xbf16>
    %cst_8 = arith.constant dense<0.000000e+00> : vector<256x128xf32>
    %10 = tpu.matmul %8, %9, %cst_8 {dimension_numbers = #tpu.dot_dimension_numbers<[1], [0], [0], [1], [0, 0, 1, 1], [], []>} : vector<256x256xbf16>, vector<256x128xbf16>, vector<256x128xf32> -> vector<256x128xf32>
    %c0_9 = arith.constant 0 : index
    %c0_10 = arith.constant 0 : index
    %11 = vector.load %arg5[%c0_9, %c0_10] : memref<1x128xf32, #tpu.memory_space<vmem>>, vector<1x128xf32>
    %12 = vector.broadcast %11 : vector<1x128xf32> to vector<256x128xf32>
    %13 = arith.addf %10, %12 : vector<256x128xf32>
    %cst_11 = arith.constant dense<0xFF800000> : vector<256xf32>
    %14 = vector.multi_reduction <maximumf>, %13, %cst_11 [1] : vector<256x128xf32> to vector<256xf32>
    %15 = vector.shape_cast %14 : vector<256xf32> to vector<256x1xf32>
    %16 = vector.broadcast %15 : vector<256x1xf32> to vector<256x128xf32>
    %17 = arith.subf %13, %16 : vector<256x128xf32>
    %18 = math.exp %17 : vector<256x128xf32>
    %cst_12 = arith.constant dense<0.000000e+00> : vector<256xf32>
    %19 = vector.multi_reduction <add>, %18, %cst_12 [1] : vector<256x128xf32> to vector<256xf32>
    %20 = vector.shape_cast %19 : vector<256xf32> to vector<256x1xf32>
    %21 = tpu.reciprocal %20 {approx = true} : vector<256x1xf32> -> vector<256x1xf32>
    %22 = vector.broadcast %21 : vector<256x1xf32> to vector<256x128xf32>
    %23 = arith.mulf %18, %22 : vector<256x128xf32>
    %c0_13 = arith.constant 0 : index
    %c0_14 = arith.constant 0 : index
    %24 = vector.load %arg6[%c0_13, %c0_14] : memref<256x128xf32, #tpu.memory_space<vmem>>, vector<256x128xf32>
    tpu.vector_store %arg6[%c0_13, %c0_14], %23 {strides = array<i32>} : memref<256x128xf32, #tpu.memory_space<vmem>>, vector<256x128xf32>,
    return
  }
  func.func @transform_0(%arg0: i32) -> (i32, i32) {
    %c0_i32 = arith.constant 0 : i32
    %c0_i32_0 = arith.constant 0 : i32
    return %arg0, %c0_i32 : i32, i32
  }
  func.func @transform_1(%arg0: i32) -> (i32, i32) {
    %c0_i32 = arith.constant 0 : i32
    %c0_i32_0 = arith.constant 0 : i32
    %c0_i32_1 = arith.constant 0 : i32
    return %c0_i32, %c0_i32_0 : i32, i32
  }
  func.func @transform_2(%arg0: i32) -> (i32, i32) {
    %c0_i32 = arith.constant 0 : i32
    %c0_i32_0 = arith.constant 0 : i32
    %c0_i32_1 = arith.constant 0 : i32
    return %c0_i32, %c0_i32_0 : i32, i32
  }
  func.func @transform_3(%arg0: i32) -> (i32, i32) {
    %c0_i32 = arith.constant 0 : i32
    %c0_i32_0 = arith.constant 0 : i32
    %c0_i32_1 = arith.constant 0 : i32
    return %c0_i32, %c0_i32_0 : i32, i32
  }
  func.func @transform_4(%arg0: i32) -> (i32, i32) {
    %c0_i32 = arith.constant 0 : i32
    %c0_i32_0 = arith.constant 0 : i32
    %c0_i32_1 = arith.constant 0 : i32
    return %c0_i32, %c0_i32_0 : i32, i32
  }
  func.func @transform_5(%arg0: i32) -> (i32, i32) {
    %c0_i32 = arith.constant 0 : i32
    %c0_i32_0 = arith.constant 0 : i32
    return %arg0, %c0_i32 : i32, i32
  }
}

</mosaic_0001>

<bundles_post_ra>
// kernel: mnist_linear_forward.1
= control target key start
LH: loop header
LB: loop body
LE: loop exit
PB: predicated region body
PF: predicated region fallthrough
CT: control target
= control target key end

     0   :  { %s5528_s1 = inlined_call_operand.vmem [shape: bf16[896,256], index: 1, kind: input, shape index: {}]   ;;  %s5529_s0 = inlined_call_operand.vmem [shape: bf16[256,896], index: 0, kind: input, shape index: {}]   ;;  %s5530_s3 = inlined_call_operand.vmem [shape: bf16[256,128], index: 3, kind: input, shape index: {}]   ;;  %s5531_s2 = inlined_call_operand.vmem [shape: f32[1,256], index: 2, kind: input, shape index: {}]   ;;  %s5532_s4 = inlined_call_operand.vmem [shape: f32[1,128], index: 4, kind: input, shape index: {}]   ;;  %s5533_s5 = inlined_call_operand.vmem [shape: f32[256,128], index: 5, kind: output, shape index: {}]  }
   0x1   :  { %v3283_v0 = vld [vmem:[%s5528_s1 + $0x74] ss:$8 sps:$4 sm:$0xff]   ;;  %v3285_v1 = vld [vmem:[%s5528_s1 + $0x70] ss:$8 sps:$4 sm:$0xff]   ;;  %v3286_v2 = vld [vmem:[%s5528_s1 + $0x64] ss:$8 sps:$4 sm:$0xff]  }
   0x2   :  { %3250 = vmatprep.subr.bf16.mxu1 %v3283_v0  ;;  %1409 = vmatprep.subr.bf16.mxu0 %v3283_v0  ;;  %v3288_v3 = vld [vmem:[%s5528_s1 + $0x60] ss:$8 sps:$4 sm:$0xff]   ;;  %v3289_v4 = vld [vmem:[%s5528_s1 + $0x54] ss:$8 sps:$4 sm:$0xff]   ;;  %v3291_v5 = vld [vmem:[%s5528_s1 + $0x50] ss:$8 sps:$4 sm:$0xff]  }
   0x3   :  { %3266 = vmatpush1.bf16.msra.mxu1 %v3285_v1  ;;  %1410 = vmatpush1.bf16.msra.mxu0 %v3285_v1  ;;  %v3292_v6 = vld [vmem:[%s5528_s1 + $0x44] ss:$8 sps:$4 sm:$0xff]   ;;  %v3294_v7 = vld [vmem:[%s5528_s1 + $0x40] ss:$8 sps:$4 sm:$0xff]   ;;  %v3295_v8 = vld [vmem:[%s5528_s1 + $0x34] ss:$8 sps:$4 sm:$0xff]  }
   0x4   :  { %3251 = vmatprep.subr.bf16.mxu1 %v3286_v2  ;;  %1411 = vmatprep.subr.bf16.mxu0 %v3286_v2  ;;  %v3297_v9 = vld [vmem:[%s5528_s1 + $0x30] ss:$8 sps:$4 sm:$0xff]   ;;  %v3298_v10 = vld [vmem:[%s5528_s1 + $0x24] ss:$8 sps:$4 sm:$0xff]   ;;  %v3300_v11 = vld [vmem:[%s5528_s1 + $0x20] ss:$8 sps:$4 sm:$0xff]  }
   0x5   :  { %v3301_v12 = vld [vmem:[%s5528_s1 + $0x14] ss:$8 sps:$4 sm:$0xff]   ;;  %v3333_v13 = vld [vmem:[%s5529_s0 + $0x1c4] ss:$28 sps:$4 sm:$0xff]   ;;  %v3303_v14 = vld [vmem:[%s5528_s1 + $0x10] ss:$8 sps:$4 sm:$0xff]  }
   0x6   :  { %v3304_v15 = vld [vmem:[%s5528_s1 + $0x4] ss:$8 sps:$4 sm:$0xff]   ;;  %1521 = vmatprep.mubr.bf16.mxu1 %v3333_v13  ;;  %v3306_v17 = vld [vmem:[%s5528_s1] ss:$8 sps:$4 sm:$0xff]   ;;  %v3307_v18 = vld [vmem:[%s5528_s1 + $0xf4] ss:$8 sps:$4 sm:$0xff]  }
   0x7   :  { %3267 = vmatpush1.bf16.msra.mxu1 %v3288_v3  ;;  %1412 = vmatpush1.bf16.msra.mxu0 %v3288_v3  ;;  %v3339_v16 = vld [vmem:[%s5529_s0 + $0x4] ss:$28 sps:$4 sm:$0xff]   ;;  %v3309_v19 = vld [vmem:[%s5528_s1 + $0xf0] ss:$8 sps:$4 sm:$0xff]   ;;  %v3313_v22 = vld [vmem:[%s5528_s1 + $0xd4] ss:$8 sps:$4 sm:$0xff]  }
   0x8   :  { %3252 = vmatprep.subr.bf16.mxu1 %v3289_v4  ;;  %1413 = vmatprep.subr.bf16.mxu0 %v3289_v4  ;;  %v3310_v20 = vld [vmem:[%s5528_s1 + $0xe4] ss:$8 sps:$4 sm:$0xff]   ;;  %v3312_v21 = vld [vmem:[%s5528_s1 + $0xe0] ss:$8 sps:$4 sm:$0xff]   ;;  %v3315_v23 = vld [vmem:[%s5528_s1 + $0xd0] ss:$8 sps:$4 sm:$0xff]  }
   0x9   :  { %1441 = vmatprep.mubr.bf16.mxu0 %v3339_v16  ;;  %v3316_v24 = vld [vmem:[%s5528_s1 + $0xc4] ss:$8 sps:$4 sm:$0xff]   ;;  %v3318_v25 = vld [vmem:[%s5528_s1 + $0xc0] ss:$8 sps:$4 sm:$0xff]   ;;  %v3319_v26 = vld [vmem:[%s5528_s1 + $0xb4] ss:$8 sps:$4 sm:$0xff]  }
   0xa   :  { %v3321_v27 = vld [vmem:[%s5528_s1 + $0xb0] ss:$8 sps:$4 sm:$0xff]   ;;  %v3322_v28 = vld [vmem:[%s5528_s1 + $0xa4] ss:$8 sps:$4 sm:$0xff]   ;;  %v3324_v29 = vld [vmem:[%s5528_s1 + $0xa0] ss:$8 sps:$4 sm:$0xff]  }
   0xb   :  { %3268 = vmatpush1.bf16.msra.mxu1 %v3291_v5  ;;  %1414 = vmatpush1.bf16.msra.mxu0 %v3291_v5  ;;  %v3325_v30 = vld [vmem:[%s5528_s1 + $0x94] ss:$8 sps:$4 sm:$0xff]   ;;  %v3327_v31 = vld [vmem:[%s5528_s1 + $0x90] ss:$8 sps:$4 sm:$0xff]   ;;  %v3328_v32 = vld [vmem:[%s5528_s1 + $0x84] ss:$8 sps:$4 sm:$0xff]  }
   0xc   :  { %3253 = vmatprep.subr.bf16.mxu1 %v3292_v6  ;;  %1415 = vmatprep.subr.bf16.mxu0 %v3292_v6  ;;  %v3330_v33 = vld [vmem:[%s5528_s1 + $0x80] ss:$8 sps:$4 sm:$0xff]   ;;  %v3336_v34 = vld [vmem:[%s5528_s1 + $0x174] ss:$8 sps:$4 sm:$0xff]   ;;  %v3334_v37 = vld [vmem:[%s5528_s1 + $0x170] ss:$8 sps:$4 sm:$0xff]  }
   0xd   :  { %v3331_v35 = vld [vmem:[%s5529_s0 + $0x1c0] ss:$28 sps:$4 sm:$0xff]   ;;  %v3340_v39 = vld [vmem:[%s5528_s1 + $0x270] ss:$8 sps:$4 sm:$0xff]   ;;  %v3345_v40 = vld [vmem:[%s5528_s1 + $0x164] ss:$8 sps:$4 sm:$0xff]  }
   0xe   :  { %v3342_v36 = vld [vmem:[%s5528_s1 + $0x274] ss:$8 sps:$4 sm:$0xff]   ;;  %v3348_v41 = vld [vmem:[%s5528_s1 + $0x264] ss:$8 sps:$4 sm:$0xff]   ;;  %v3343_v44 = vld [vmem:[%s5528_s1 + $0x160] ss:$8 sps:$4 sm:$0xff]  }
   0xf   :  { %3269 = vmatpush1.bf16.msra.mxu1 %v3294_v7  ;;  %1416 = vmatpush1.bf16.msra.mxu0 %v3294_v7  ;;  %v3337_v38 = vld [vmem:[%s5529_s0] ss:$28 sps:$4 sm:$0xff]   ;;  %v3351_v47 = vld [vmem:[%s5529_s0 + $0x1f8] ss:$28 sps:$4 sm:$0xff]   ;;  %v3363_v52 = vld [vmem:[%s5528_s1 + $0x144] ss:$8 sps:$4 sm:$0xff]  }
  0x10   :  { %3254 = vmatprep.subr.bf16.mxu1 %v3295_v8  ;;  %1417 = vmatprep.subr.bf16.mxu0 %v3295_v8  ;;  %v3349_v42 = vld [vmem:[%s5529_s0 + $0x1fc] ss:$28 sps:$4 sm:$0xff]   ;;  %v3346_v45 = vld [vmem:[%s5528_s1 + $0x260] ss:$8 sps:$4 sm:$0xff]   ;;  %v3366_v53 = vld [vmem:[%s5528_s1 + $0x244] ss:$8 sps:$4 sm:$0xff]  }
  0x11   :  { %v3355_v43 = vld [vmem:[%s5529_s0 + $0x3c] ss:$28 sps:$4 sm:$0xff]   ;;  %v3367_v54 = vld [vmem:[%s5529_s0 + $0x234] ss:$28 sps:$4 sm:$0xff]   ;;  %v3361_v56 = vld [vmem:[%s5528_s1 + $0x140] ss:$8 sps:$4 sm:$0xff]  }
  0x12   :  { %v3354_v46 = vld [vmem:[%s5528_s1 + $0x154] ss:$8 sps:$4 sm:$0xff]   ;;  %v3352_v49 = vld [vmem:[%s5528_s1 + $0x150] ss:$8 sps:$4 sm:$0xff]   ;;  %v3364_v57 = vld [vmem:[%s5528_s1 + $0x240] ss:$8 sps:$4 sm:$0xff]  }
  0x13   :  { %3270 = vmatpush1.bf16.msra.mxu1 %v3297_v9  ;;  %1418 = vmatpush1.bf16.msra.mxu0 %v3297_v9  ;;  %v3360_v48 = vld [vmem:[%s5528_s1 + $0x254] ss:$8 sps:$4 sm:$0xff]   ;;  %v3358_v51 = vld [vmem:[%s5528_s1 + $0x250] ss:$8 sps:$4 sm:$0xff]   ;;  %v3381_v0 = vld [vmem:[%s5528_s1 + $0x124] ss:$8 sps:$4 sm:$0xff]  }
  0x14   :  { %3255 = vmatprep.subr.bf16.mxu1 %v3298_v10  ;;  %1419 = vmatprep.subr.bf16.mxu0 %v3298_v10  ;;  %v3357_v50 = vld [vmem:[%s5529_s0 + $0x38] ss:$28 sps:$4 sm:$0xff]   ;;  %v3369_v59 = vld [vmem:[%s5529_s0 + $0x230] ss:$28 sps:$4 sm:$0xff]   ;;  %v3379_v4 = vld [vmem:[%s5528_s1 + $0x120] ss:$8 sps:$4 sm:$0xff]  }
  0x15   :  { %v3373_v55 = vld [vmem:[%s5529_s0 + $0x74] ss:$28 sps:$4 sm:$0xff]   ;;  %v3384_v1 = vld [vmem:[%s5528_s1 + $0x224] ss:$8 sps:$4 sm:$0xff]   ;;  %v3382_v5 = vld [vmem:[%s5528_s1 + $0x220] ss:$8 sps:$4 sm:$0xff]  }
  0x16   :  { %v3372_v58 = vld [vmem:[%s5528_s1 + $0x134] ss:$8 sps:$4 sm:$0xff]   ;;  %v3370_v61 = vld [vmem:[%s5528_s1 + $0x130] ss:$8 sps:$4 sm:$0xff]   ;;  %v3385_v2 = vld [vmem:[%s5529_s0 + $0x26c] ss:$28 sps:$4 sm:$0xff]  }
  0x17   :  { %3271 = vmatpush1.bf16.msra.mxu1 %v3300_v11  ;;  %1420 = vmatpush1.bf16.msra.mxu0 %v3300_v11  ;;  %v3378_v60 = vld [vmem:[%s5528_s1 + $0x234] ss:$8 sps:$4 sm:$0xff]   ;;  %v3375_v62 = vld [vmem:[%s5529_s0 + $0x70] ss:$28 sps:$4 sm:$0xff]   ;;  %v3387_v7 = vld [vmem:[%s5529_s0 + $0x268] ss:$28 sps:$4 sm:$0xff]  }
  0x18   :  { %3256 = vmatprep.subr.bf16.mxu1 %v3301_v12  ;;  %1421 = vmatprep.subr.bf16.mxu0 %v3301_v12  ;;  %v3376_v63 = vld [vmem:[%s5528_s1 + $0x230] ss:$8 sps:$4 sm:$0xff]   ;;  %v3391_v3 = vld [vmem:[%s5529_s0 + $0xac] ss:$28 sps:$4 sm:$0xff]   ;;  %v3390_v6 = vld [vmem:[%s5528_s1 + $0x114] ss:$8 sps:$4 sm:$0xff]  }
  0x19   :  { %v3396_v8 = vld [vmem:[%s5528_s1 + $0x214] ss:$8 sps:$4 sm:$0xff]   ;;  %v3388_v9 = vld [vmem:[%s5528_s1 + $0x110] ss:$8 sps:$4 sm:$0xff]   ;;  %v3393_v10 = vld [vmem:[%s5529_s0 + $0xa8] ss:$28 sps:$4 sm:$0xff]  }
  0x1a   :  { %v3394_v11 = vld [vmem:[%s5528_s1 + $0x210] ss:$8 sps:$4 sm:$0xff]   ;;  %v3399_v12 = vld [vmem:[%s5528_s1 + $0x104] ss:$8 sps:$4 sm:$0xff]   ;;  %v3397_v16 = vld [vmem:[%s5528_s1 + $0x100] ss:$8 sps:$4 sm:$0xff]  }
  0x1b   :  { %3272 = vmatpush1.bf16.msra.mxu1 %v3303_v14  ;;  %1422 = vmatpush1.bf16.msra.mxu0 %v3303_v14  ;;  %v3402_v13 = vld [vmem:[%s5528_s1 + $0x204] ss:$8 sps:$4 sm:$0xff]  }
  0x1c   :  { %3257 = vmatprep.subr.bf16.mxu1 %v3304_v15  ;;  %1423 = vmatprep.subr.bf16.mxu0 %v3304_v15  ;;  %v3403_v14 = vld [vmem:[%s5529_s0 + $0x2a4] ss:$28 sps:$4 sm:$0xff]  }
  0x1d   :  { %v3409_v15 = vld [vmem:[%s5529_s0 + $0xe4] ss:$28 sps:$4 sm:$0xff]  }
  0x1f   :  { %3273 = vmatpush1.bf16.msra.mxu1 %v3306_v17  ;;  %1424 = vmatpush1.bf16.msra.mxu0 %v3306_v17  ;;  %v3400_v17 = vld [vmem:[%s5528_s1 + $0x200] ss:$8 sps:$4 sm:$0xff]  }
  0x20   :  { %3258 = vmatprep.subr.bf16.mxu1 %v3307_v18  ;;  %1425 = vmatprep.subr.bf16.mxu0 %v3307_v18  ;;  %v3408_v18 = vld [vmem:[%s5528_s1 + $0x1f4] ss:$8 sps:$4 sm:$0xff]  }
  0x23   :  { %3274 = vmatpush2.bf16.msra.mxu1 %v3309_v19  ;;  %1426 = vmatpush2.bf16.msra.mxu0 %v3309_v19  ;;  %v3405_v19 = vld [vmem:[%s5529_s0 + $0x2a0] ss:$28 sps:$4 sm:$0xff]  }
  0x24   :  { %3259 = vmatprep.subr.bf16.mxu1 %v3310_v20  ;;  %1427 = vmatprep.subr.bf16.mxu0 %v3310_v20  ;;  %v3414_v20 = vld [vmem:[%s5528_s1 + $0x2f4] ss:$8 sps:$4 sm:$0xff]  }
  0x27   :  { %3275 = vmatpush2.bf16.msra.mxu1 %v3312_v21  ;;  %1428 = vmatpush2.bf16.msra.mxu0 %v3312_v21  ;;  %v3406_v21 = vld [vmem:[%s5528_s1 + $0x1f0] ss:$8 sps:$4 sm:$0xff]  }
  0x28   :  { %3260 = vmatprep.subr.bf16.mxu1 %v3313_v22  ;;  %1429 = vmatprep.subr.bf16.mxu0 %v3313_v22  ;;  %v3411_v22 = vld [vmem:[%s5529_s0 + $0xe0] ss:$28 sps:$4 sm:$0xff]  }
  0x2b   :  { %3276 = vmatpush2.bf16.msra.mxu1 %v3315_v23  ;;  %1430 = vmatpush2.bf16.msra.mxu0 %v3315_v23  ;;  %v3412_v23 = vld [vmem:[%s5528_s1 + $0x2f0] ss:$8 sps:$4 sm:$0xff]  }
  0x2c   :  { %3261 = vmatprep.subr.bf16.mxu1 %v3316_v24  ;;  %1431 = vmatprep.subr.bf16.mxu0 %v3316_v24  ;;  %v3417_v24 = vld [vmem:[%s5528_s1 + $0x1e4] ss:$8 sps:$4 sm:$0xff]  }
  0x2f   :  { %3277 = vmatpush2.bf16.msra.mxu1 %v3318_v25  ;;  %1432 = vmatpush2.bf16.msra.mxu0 %v3318_v25  ;;  %v3420_v25 = vld [vmem:[%s5528_s1 + $0x2e4] ss:$8 sps:$4 sm:$0xff]  }
  0x30   :  { %3262 = vmatprep.subr.bf16.mxu1 %v3319_v26  ;;  %1433 = vmatprep.subr.bf16.mxu0 %v3319_v26  ;;  %v3421_v26 = vld [vmem:[%s5529_s0 + $0x2dc] ss:$28 sps:$4 sm:$0xff]  }
  0x33   :  { %3278 = vmatpush2.bf16.msra.mxu1 %v3321_v27  ;;  %1434 = vmatpush2.bf16.msra.mxu0 %v3321_v27  ;;  %v3427_v27 = vld [vmem:[%s5529_s0 + $0x11c] ss:$28 sps:$4 sm:$0xff]  }
  0x34   :  { %3263 = vmatprep.subr.bf16.mxu1 %v3322_v28  ;;  %1435 = vmatprep.subr.bf16.mxu0 %v3322_v28  ;;  %v3415_v28 = vld [vmem:[%s5528_s1 + $0x1e0] ss:$8 sps:$4 sm:$0xff]  }
  0x37   :  { %3279 = vmatpush2.bf16.msra.mxu1 %v3324_v29  ;;  %1436 = vmatpush2.bf16.msra.mxu0 %v3324_v29  ;;  %v3418_v29 = vld [vmem:[%s5528_s1 + $0x2e0] ss:$8 sps:$4 sm:$0xff]  }
  0x38   :  { %3264 = vmatprep.subr.bf16.mxu1 %v3325_v30  ;;  %1437 = vmatprep.subr.bf16.mxu0 %v3325_v30  ;;  %v3426_v30 = vld [vmem:[%s5528_s1 + $0x1d4] ss:$8 sps:$4 sm:$0xff]  }
  0x3b   :  { %3280 = vmatpush2.bf16.msra.mxu1 %v3327_v31  ;;  %1438 = vmatpush2.bf16.msra.mxu0 %v3327_v31  ;;  %v3423_v31 = vld [vmem:[%s5529_s0 + $0x2d8] ss:$28 sps:$4 sm:$0xff]  }
  0x3c   :  { %3265 = vmatprep.subr.bf16.mxu1 %v3328_v32  ;;  %1439 = vmatprep.subr.bf16.mxu0 %v3328_v32  ;;  %v3432_v32 = vld [vmem:[%s5528_s1 + $0x2d4] ss:$8 sps:$4 sm:$0xff]  }
  0x3f   :  { %3281 = vmatpush2.bf16.msra.mxu1 %v3330_v33  ;;  %1440 = vmatpush2.bf16.msra.mxu0 %v3330_v33  ;;  %v3424_v33 = vld [vmem:[%s5528_s1 + $0x1d0] ss:$8 sps:$4 sm:$0xff]  }
  0x40   :  { %1602 = vmatprep.subr.bf16.mxu1 %v3336_v34  ;;  %1795 = vmatprep.subr.bf16.mxu0 %v3342_v36  ;;  %v3429_v34 = vld [vmem:[%s5529_s0 + $0x118] ss:$28 sps:$4 sm:$0xff]   ;;  %v3435_v36 = vld [vmem:[%s5528_s1 + $0x1c4] ss:$8 sps:$4 sm:$0xff]  }
  0x42   :  { %1522 = vmatmul.mubr.bf16.vlgmr.msra.gmra.mxu1 %v3331_v35  ;;  %1442 = vmatmul.mubr.bf16.vlgmr.msra.gmra.mxu0 %v3337_v38  ;;  %v3430_v35 = vld [vmem:[%s5528_s1 + $0x2d0] ss:$8 sps:$4 sm:$0xff]  }
  0x43   :  { %1603 = vmatpush1.bf16.msra.mxu1 %v3334_v37  ;;  %1796 = vmatpush1.bf16.msra.mxu0 %v3340_v39  ;;  %v3438_v37 = vld [vmem:[%s5528_s1 + $0x2c4] ss:$8 sps:$4 sm:$0xff]   ;;  %v3439_v38 = vld [vmem:[%s5529_s0 + $0x314] ss:$28 sps:$4 sm:$0xff]  }
  0x44   :  { %1604 = vmatprep.subr.bf16.mxu1 %v3345_v40  ;;  %1797 = vmatprep.subr.bf16.mxu0 %v3348_v41  ;;  %v3445_v39 = vld [vmem:[%s5529_s0 + $0x154] ss:$28 sps:$4 sm:$0xff]   ;;  %v3433_v40 = vld [vmem:[%s5528_s1 + $0x1c0] ss:$8 sps:$4 sm:$0xff]  }
  0x45   :  { %1531 = vmatprep.mubr.bf16.mxu1 %v3349_v42  ;;  %1451 = vmatprep.mubr.bf16.mxu0 %v3355_v43  ;;  %v3436_v41 = vld [vmem:[%s5528_s1 + $0x2c0] ss:$8 sps:$4 sm:$0xff]   ;;  %v3444_v42 = vld [vmem:[%s5528_s1 + $0x1b4] ss:$8 sps:$4 sm:$0xff]   ;;  %v3441_v43 = vld [vmem:[%s5529_s0 + $0x310] ss:$28 sps:$4 sm:$0xff]  }
  0x47   :  { %1605 = vmatpush1.bf16.msra.mxu1 %v3343_v44  ;;  %1798 = vmatpush1.bf16.msra.mxu0 %v3346_v45  ;;  %v3450_v44 = vld [vmem:[%s5528_s1 + $0x2b4] ss:$8 sps:$4 sm:$0xff]   ;;  %v3442_v45 = vld [vmem:[%s5528_s1 + $0x1b0] ss:$8 sps:$4 sm:$0xff]  }
  0x48   :  { %1606 = vmatprep.subr.bf16.mxu1 %v3354_v46  ;;  %1799 = vmatprep.subr.bf16.mxu0 %v3360_v48  ;;  %v3447_v46 = vld [vmem:[%s5529_s0 + $0x150] ss:$28 sps:$4 sm:$0xff]  }
  0x49   :  { %v3453_v48 = vld [vmem:[%s5528_s1 + $0x1a4] ss:$8 sps:$4 sm:$0xff]  }
  0x4a   :  { %1532 = vmatmul.mubr.bf16.gmra.mxu1 %v3351_v47  ;;  %1452 = vmatmul.mubr.bf16.gmra.mxu0 %v3357_v50  ;;  %v3448_v47 = vld [vmem:[%s5528_s1 + $0x2b0] ss:$8 sps:$4 sm:$0xff]   ;;  %v3457_v50 = vld [vmem:[%s5529_s0 + $0x34c] ss:$28 sps:$4 sm:$0xff]  }
  0x4b   :  { %1607 = vmatpush1.bf16.msra.mxu1 %v3352_v49  ;;  %1800 = vmatpush1.bf16.msra.mxu0 %v3358_v51  ;;  %v3456_v49 = vld [vmem:[%s5528_s1 + $0x2a4] ss:$8 sps:$4 sm:$0xff]  }
  0x4c   :  { %1608 = vmatprep.subr.bf16.mxu1 %v3363_v52  ;;  %1801 = vmatprep.subr.bf16.mxu0 %v3366_v53  ;;  %v3463_v51 = vld [vmem:[%s5529_s0 + $0x18c] ss:$28 sps:$4 sm:$0xff]  }
  0x4d   :  { %1541 = vmatprep.mubr.bf16.mxu1 %v3367_v54  ;;  %1461 = vmatprep.mubr.bf16.mxu0 %v3373_v55  ;;  %v3451_v52 = vld [vmem:[%s5528_s1 + $0x1a0] ss:$8 sps:$4 sm:$0xff]   ;;  %v3462_v54 = vld [vmem:[%s5528_s1 + $0x194] ss:$8 sps:$4 sm:$0xff]  }
  0x4e   :  { %v3454_v53 = vld [vmem:[%s5528_s1 + $0x2a0] ss:$8 sps:$4 sm:$0xff]  }
  0x4f   :  { %1609 = vmatpush1.bf16.msra.mxu1 %v3361_v56  ;;  %1802 = vmatpush1.bf16.msra.mxu0 %v3364_v57  ;;  %v3459_v55 = vld [vmem:[%s5529_s0 + $0x348] ss:$28 sps:$4 sm:$0xff]   ;;  %v3468_v56 = vld [vmem:[%s5528_s1 + $0x294] ss:$8 sps:$4 sm:$0xff]   ;;  %v3460_v57 = vld [vmem:[%s5528_s1 + $0x190] ss:$8 sps:$4 sm:$0xff]  }
  0x50   :  { %1610 = vmatprep.subr.bf16.mxu1 %v3372_v58  ;;  %1803 = vmatprep.subr.bf16.mxu0 %v3378_v60  ;;  %v3465_v58 = vld [vmem:[%s5529_s0 + $0x188] ss:$28 sps:$4 sm:$0xff]  }
  0x51   :  { %v3471_v60 = vld [vmem:[%s5528_s1 + $0x184] ss:$8 sps:$4 sm:$0xff]  }
  0x52   :  { %1542 = vmatmul.mubr.bf16.gmra.mxu1 %v3369_v59  ;;  %1462 = vmatmul.mubr.bf16.gmra.mxu0 %v3375_v62  ;;  %v3466_v59 = vld [vmem:[%s5528_s1 + $0x290] ss:$8 sps:$4 sm:$0xff]   ;;  %v3477_v62 = vld [vmem:[%s5529_s0 + $0xc] ss:$28 sps:$4 sm:$0xff]  }
  0x53   :  { %1611 = vmatpush1.bf16.msra.mxu1 %v3370_v61  ;;  %1804 = vmatpush1.bf16.msra.mxu0 %v3376_v63  ;;  %v3474_v61 = vld [vmem:[%s5528_s1 + $0x284] ss:$8 sps:$4 sm:$0xff]   ;;  %v3483_v63 = vld [vmem:[%s5529_s0 + $0x14] ss:$28 sps:$4 sm:$0xff]  }
  0x54   :  { %1612 = vmatprep.subr.bf16.mxu1 %v3381_v0  ;;  %1805 = vmatprep.subr.bf16.mxu0 %v3384_v1  ;;  %v3469_v0 = vld [vmem:[%s5528_s1 + $0x180] ss:$8 sps:$4 sm:$0xff]  }
  0x55   :  { %1551 = vmatprep.mubr.bf16.mxu1 %v3385_v2  ;;  %1471 = vmatprep.mubr.bf16.mxu0 %v3391_v3  ;;  %v3472_v1 = vld [vmem:[%s5528_s1 + $0x280] ss:$8 sps:$4 sm:$0xff]   ;;  %v3480_v2 = vld [vmem:[%s5528_s1 + $0x374] ss:$8 sps:$4 sm:$0xff]  }
  0x56   :  { %v3475_v3 = vld [vmem:[%s5529_s0 + $0x8] ss:$28 sps:$4 sm:$0xff]  }
  0x57   :  { %1613 = vmatpush1.bf16.msra.mxu1 %v3379_v4  ;;  %1806 = vmatpush1.bf16.msra.mxu0 %v3382_v5  ;;  %v3478_v4 = vld [vmem:[%s5528_s1 + $0x370] ss:$8 sps:$4 sm:$0xff]  }
  0x58   :  { %1614 = vmatprep.subr.bf16.mxu1 %v3390_v6  ;;  %1807 = vmatprep.subr.bf16.mxu0 %v3396_v8  ;;  %v3481_v5 = vld [vmem:[%s5529_s0 + $0x10] ss:$28 sps:$4 sm:$0xff]   ;;  %v3484_v6 = vld [vmem:[%s5529_s0 + $0x44] ss:$28 sps:$4 sm:$0xff]  }
  0x59   :  { %v3495_v8 = vld [vmem:[%s5528_s1 + $0x364] ss:$8 sps:$4 sm:$0xff]  }
  0x5a   :  { %1552 = vmatmul.mubr.bf16.gmra.mxu1 %v3387_v7  ;;  %1472 = vmatmul.mubr.bf16.gmra.mxu0 %v3393_v10  ;;  %v3487_v7 = vld [vmem:[%s5529_s0 + $0x4c] ss:$28 sps:$4 sm:$0xff]   ;;  %v3510_v10 = vld [vmem:[%s5528_s1 + $0x354] ss:$8 sps:$4 sm:$0xff]  }
  0x5b   :  { %1615 = vmatpush1.bf16.msra.mxu1 %v3388_v9  ;;  %1808 = vmatpush1.bf16.msra.mxu0 %v3394_v11  ;;  %v3493_v9 = vld [vmem:[%s5528_s1 + $0x360] ss:$8 sps:$4 sm:$0xff]  }
  0x5c   :  { %1616 = vmatprep.subr.bf16.mxu1 %v3399_v12  ;;  %1809 = vmatprep.subr.bf16.mxu0 %v3402_v13  ;;  %v3486_v11 = vld [vmem:[%s5529_s0 + $0x40] ss:$28 sps:$4 sm:$0xff]   ;;  %v3489_v12 = vld [vmem:[%s5529_s0 + $0x48] ss:$28 sps:$4 sm:$0xff]  }
  0x5d   :  { %1561 = vmatprep.mubr.bf16.mxu1 %v3403_v14  ;;  %1481 = vmatprep.mubr.bf16.mxu0 %v3409_v15  ;;  %v3490_v13 = vld [vmem:[%s5529_s0 + $0x7c] ss:$28 sps:$4 sm:$0xff]   ;;  %v3496_v14 = vld [vmem:[%s5529_s0 + $0x84] ss:$28 sps:$4 sm:$0xff]  }
  0x5e   :  { %v3508_v15 = vld [vmem:[%s5528_s1 + $0x350] ss:$8 sps:$4 sm:$0xff]  }
  0x5f   :  { %1617 = vmatpush1.bf16.msra.mxu1 %v3397_v16  ;;  %1810 = vmatpush1.bf16.msra.mxu0 %v3400_v17  ;;  %v3525_v16 = vld [vmem:[%s5528_s1 + $0x344] ss:$8 sps:$4 sm:$0xff]   ;;  %v3523_v17 = vld [vmem:[%s5528_s1 + $0x340] ss:$8 sps:$4 sm:$0xff]  }
  0x60   :  { %1618 = vmatprep.subr.bf16.mxu1 %v3408_v18  ;;  %1811 = vmatprep.subr.bf16.mxu0 %v3414_v20  ;;  %v3492_v18 = vld [vmem:[%s5529_s0 + $0x78] ss:$28 sps:$4 sm:$0xff]  }
  0x61   :  { %v3540_v20 = vld [vmem:[%s5528_s1 + $0x334] ss:$8 sps:$4 sm:$0xff]  }
  0x62   :  { %1562 = vmatmul.mubr.bf16.gmra.mxu1 %v3405_v19  ;;  %1482 = vmatmul.mubr.bf16.gmra.mxu0 %v3411_v22  ;;  %v3498_v19 = vld [vmem:[%s5529_s0 + $0x80] ss:$28 sps:$4 sm:$0xff]  }
  0x63   :  { %1619 = vmatpush2.bf16.msra.mxu1 %v3406_v21  ;;  %1812 = vmatpush2.bf16.msra.mxu0 %v3412_v23  ;;  %v3499_v21 = vld [vmem:[%s5529_s0 + $0xb4] ss:$28 sps:$4 sm:$0xff]   ;;  %v3502_v22 = vld [vmem:[%s5529_s0 + $0xbc] ss:$28 sps:$4 sm:$0xff]  }
  0x64   :  { %1620 = vmatprep.subr.bf16.mxu1 %v3417_v24  ;;  %1813 = vmatprep.subr.bf16.mxu0 %v3420_v25  ;;  %v3538_v23 = vld [vmem:[%s5528_s1 + $0x330] ss:$8 sps:$4 sm:$0xff]   ;;  %v3555_v24 = vld [vmem:[%s5528_s1 + $0x324] ss:$8 sps:$4 sm:$0xff]   ;;  %v3553_v25 = vld [vmem:[%s5528_s1 + $0x320] ss:$8 sps:$4 sm:$0xff]  }
  0x65   :  { %1571 = vmatprep.mubr.bf16.mxu1 %v3421_v26  ;;  %1491 = vmatprep.mubr.bf16.mxu0 %v3427_v27  ;;  %v3570_v26 = vld [vmem:[%s5528_s1 + $0x314] ss:$8 sps:$4 sm:$0xff]   ;;  %v3501_v27 = vld [vmem:[%s5529_s0 + $0xb0] ss:$28 sps:$4 sm:$0xff]  }
  0x67   :  { %1621 = vmatpush2.bf16.msra.mxu1 %v3415_v28  ;;  %1814 = vmatpush2.bf16.msra.mxu0 %v3418_v29  ;;  %v3504_v28 = vld [vmem:[%s5529_s0 + $0xb8] ss:$28 sps:$4 sm:$0xff]   ;;  %v3505_v29 = vld [vmem:[%s5529_s0 + $0xec] ss:$28 sps:$4 sm:$0xff]  }
  0x68   :  { %1622 = vmatprep.subr.bf16.mxu1 %v3426_v30  ;;  %1815 = vmatprep.subr.bf16.mxu0 %v3432_v32  ;;  %v3511_v30 = vld [vmem:[%s5529_s0 + $0xf4] ss:$28 sps:$4 sm:$0xff]   ;;  %v3585_v32 = vld [vmem:[%s5528_s1 + $0x304] ss:$8 sps:$4 sm:$0xff]  }
  0x6a   :  { %1572 = vmatmul.mubr.bf16.gmra.mxu1 %v3423_v31  ;;  %1492 = vmatmul.mubr.bf16.gmra.mxu0 %v3429_v34  ;;  %v3568_v31 = vld [vmem:[%s5528_s1 + $0x310] ss:$8 sps:$4 sm:$0xff]   ;;  %v3507_v34 = vld [vmem:[%s5529_s0 + $0xe8] ss:$28 sps:$4 sm:$0xff]  }
  0x6b   :  { %1623 = vmatpush2.bf16.msra.mxu1 %v3424_v33  ;;  %1816 = vmatpush2.bf16.msra.mxu0 %v3430_v35  ;;  %v3583_v33 = vld [vmem:[%s5528_s1 + $0x300] ss:$8 sps:$4 sm:$0xff]   ;;  %v3513_v35 = vld [vmem:[%s5529_s0 + $0xf0] ss:$28 sps:$4 sm:$0xff]  }
  0x6c   :  { %1624 = vmatprep.subr.bf16.mxu1 %v3435_v36  ;;  %1817 = vmatprep.subr.bf16.mxu0 %v3438_v37  ;;  %v3514_v36 = vld [vmem:[%s5529_s0 + $0x124] ss:$28 sps:$4 sm:$0xff]   ;;  %v3517_v37 = vld [vmem:[%s5529_s0 + $0x12c] ss:$28 sps:$4 sm:$0xff]  }
  0x6d   :  { %1581 = vmatprep.mubr.bf16.mxu1 %v3439_v38  ;;  %1501 = vmatprep.mubr.bf16.mxu0 %v3445_v39  ;;  %v3516_v38 = vld [vmem:[%s5529_s0 + $0x120] ss:$28 sps:$4 sm:$0xff]   ;;  %v3519_v39 = vld [vmem:[%s5529_s0 + $0x128] ss:$28 sps:$4 sm:$0xff]  }
  0x6f   :  { %1625 = vmatpush2.bf16.msra.mxu1 %v3433_v40  ;;  %1818 = vmatpush2.bf16.msra.mxu0 %v3436_v41  ;;  %v3520_v40 = vld [vmem:[%s5529_s0 + $0x15c] ss:$28 sps:$4 sm:$0xff]   ;;  %v3526_v41 = vld [vmem:[%s5529_s0 + $0x164] ss:$28 sps:$4 sm:$0xff]  }
  0x70   :  { %1626 = vmatprep.subr.bf16.mxu1 %v3444_v42  ;;  %1819 = vmatprep.subr.bf16.mxu0 %v3450_v44  ;;  %v3522_v42 = vld [vmem:[%s5529_s0 + $0x158] ss:$28 sps:$4 sm:$0xff]  }
  0x71   :  { %v3529_v44 = vld [vmem:[%s5529_s0 + $0x194] ss:$28 sps:$4 sm:$0xff]  }
  0x72   :  { %1582 = vmatmul.mubr.bf16.gmra.mxu1 %v3441_v43  ;;  %1502 = vmatmul.mubr.bf16.gmra.mxu0 %v3447_v46  ;;  %v3528_v43 = vld [vmem:[%s5529_s0 + $0x160] ss:$28 sps:$4 sm:$0xff]   ;;  %v3531_v46 = vld [vmem:[%s5529_s0 + $0x190] ss:$28 sps:$4 sm:$0xff]  }
  0x73   :  { %1627 = vmatpush2.bf16.msra.mxu1 %v3442_v45  ;;  %1820 = vmatpush2.bf16.msra.mxu0 %v3448_v47  ;;  %v3532_v45 = vld [vmem:[%s5529_s0 + $0x19c] ss:$28 sps:$4 sm:$0xff]  }
  0x74   :  { %1628 = vmatprep.subr.bf16.mxu1 %v3453_v48  ;;  %1821 = vmatprep.subr.bf16.mxu0 %v3456_v49  ;;  %v3534_v47 = vld [vmem:[%s5529_s0 + $0x198] ss:$28 sps:$4 sm:$0xff]   ;;  %v3535_v48 = vld [vmem:[%s5529_s0 + $0x1cc] ss:$28 sps:$4 sm:$0xff]  }
  0x75   :  { %1591 = vmatprep.mubr.bf16.mxu1 %v3457_v50  ;;  %1511 = vmatprep.mubr.bf16.mxu0 %v3463_v51  ;;  %v3541_v49 = vld [vmem:[%s5529_s0 + $0x1d4] ss:$28 sps:$4 sm:$0xff]   ;;  %v3537_v50 = vld [vmem:[%s5529_s0 + $0x1c8] ss:$28 sps:$4 sm:$0xff]  }
  0x76   :  { %v3543_v51 = vld [vmem:[%s5529_s0 + $0x1d0] ss:$28 sps:$4 sm:$0xff]  }
  0x77   :  { %1629 = vmatpush2.bf16.msra.mxu1 %v3451_v52  ;;  %1822 = vmatpush2.bf16.msra.mxu0 %v3454_v53  ;;  %v3544_v52 = vld [vmem:[%s5529_s0 + $0x204] ss:$28 sps:$4 sm:$0xff]   ;;  %v3547_v53 = vld [vmem:[%s5529_s0 + $0x20c] ss:$28 sps:$4 sm:$0xff]  }
  0x78   :  { %1630 = vmatprep.subr.bf16.mxu1 %v3462_v54  ;;  %1823 = vmatprep.subr.bf16.mxu0 %v3468_v56  ;;  %v3546_v54 = vld [vmem:[%s5529_s0 + $0x200] ss:$28 sps:$4 sm:$0xff]  }
  0x79   :  { %v3550_v56 = vld [vmem:[%s5529_s0 + $0x23c] ss:$28 sps:$4 sm:$0xff]  }
  0x7a   :  { %1592 = vmatmul.mubr.bf16.gmra.mxu1 %v3459_v55  ;;  %1512 = vmatmul.mubr.bf16.gmra.mxu0 %v3465_v58  ;;  %v3549_v55 = vld [vmem:[%s5529_s0 + $0x208] ss:$28 sps:$4 sm:$0xff]   ;;  %v3552_v58 = vld [vmem:[%s5529_s0 + $0x238] ss:$28 sps:$4 sm:$0xff]  }
  0x7b   :  { %1631 = vmatpush2.bf16.msra.mxu1 %v3460_v57  ;;  %1824 = vmatpush2.bf16.msra.mxu0 %v3466_v59  ;;  %v3556_v57 = vld [vmem:[%s5529_s0 + $0x244] ss:$28 sps:$4 sm:$0xff]  }
  0x7c   :  { %1632 = vmatprep.subr.bf16.mxu1 %v3471_v60  ;;  %1825 = vmatprep.subr.bf16.mxu0 %v3474_v61  ;;  %v3558_v59 = vld [vmem:[%s5529_s0 + $0x240] ss:$28 sps:$4 sm:$0xff]   ;;  %v3559_v60 = vld [vmem:[%s5529_s0 + $0x274] ss:$28 sps:$4 sm:$0xff]  }
  0x7d   :  { %1634 = vmatprep.mubr.bf16.mxu1 %v3477_v62  ;;  %1827 = vmatprep.mubr.bf16.mxu0 %v3483_v63  ;;  %v3562_v61 = vld [vmem:[%s5529_s0 + $0x27c] ss:$28 sps:$4 sm:$0xff]  }
  0x7e   :  { %v3605_v62 = vld [vmem:[%s5530_s3 + $0x78] sm:$0xff]  }
  0x7f   :  { %1633 = vmatpush2.bf16.msra.mxu1 %v3469_v0  ;;  %1826 = vmatpush2.bf16.msra.mxu0 %v3472_v1  ;;  %v3606_v63 = vld [vmem:[%s5530_s3 + $0x38] sm:$0xff]   ;;  %v3561_v0 = vld [vmem:[%s5529_s0 + $0x270] ss:$28 sps:$4 sm:$0xff]  }
  0x80   :  { %1988 = vmatprep.subr.bf16.mxu1 %v3480_v2  ;;  %v3564_v1 = vld [vmem:[%s5529_s0 + $0x278] ss:$28 sps:$4 sm:$0xff]   ;;  %3138 = vmatprep.subr.bf16.mxu0 %v3605_v62  ;;  %v3565_v2 = vld [vmem:[%s5529_s0 + $0x2ac] ss:$28 sps:$4 sm:$0xff]  }
  0x82   :  { %1635 = vmatmul.mubr.bf16.vlgmr.msra.gmra.mxu1 %v3475_v3  ;;  %1828 = vmatmul.mubr.bf16.vlgmr.msra.gmra.mxu0 %v3481_v5  ;;  %v3571_v3 = vld [vmem:[%s5529_s0 + $0x2b4] ss:$28 sps:$4 sm:$0xff]  }
  0x83   :  { %1989 = vmatpush1.bf16.msra.mxu1 %v3478_v4  ;;  %1644 = vmatprep.mubr.bf16.mxu1 %v3484_v6  ;;  %v3567_v4 = vld [vmem:[%s5529_s0 + $0x2a8] ss:$28 sps:$4 sm:$0xff]   ;;  %v3573_v5 = vld [vmem:[%s5529_s0 + $0x2b0] ss:$28 sps:$4 sm:$0xff]  }
  0x84   :  { %1837 = vmatprep.mubr.bf16.mxu0 %v3487_v7  ;;  %1990 = vmatprep.subr.bf16.mxu1 %v3495_v8  ;;  %v3574_v6 = vld [vmem:[%s5529_s0 + $0x2e4] ss:$28 sps:$4 sm:$0xff]   ;;  %v3577_v7 = vld [vmem:[%s5529_s0 + $0x2ec] ss:$28 sps:$4 sm:$0xff]   ;;  %v3609_v8 = vld [vmem:[%s5530_s3 + $0x70] sm:$0xff]  }
  0x85   :  { %3139 = vmatpush3.bf16.msra.mxu0 %v3606_v63 }
  0x86   :  { %3140 = vmatprep.subr.bf16.mxu0 %v3609_v8 }
  0x87   :  { %1991 = vmatpush1.bf16.msra.mxu1 %v3493_v9  ;;  %v3610_v9 = vld [vmem:[%s5530_s3 + $0x30] sm:$0xff]  }
  0x88   :  { %1992 = vmatprep.subr.bf16.mxu1 %v3510_v10  ;;  %v3576_v10 = vld [vmem:[%s5529_s0 + $0x2e0] ss:$28 sps:$4 sm:$0xff]  }
  0x89   :  { %3141 = vmatpush3.bf16.msra.mxu0 %v3610_v9 }
  0x8a   :  { %1645 = vmatmul.mubr.bf16.gmra.mxu1 %v3486_v11  ;;  %1838 = vmatmul.mubr.bf16.gmra.mxu0 %v3489_v12  ;;  %v3579_v11 = vld [vmem:[%s5529_s0 + $0x2e8] ss:$28 sps:$4 sm:$0xff]   ;;  %v3580_v12 = vld [vmem:[%s5529_s0 + $0x31c] ss:$28 sps:$4 sm:$0xff]  }
  0x8b   :  { %1654 = vmatprep.mubr.bf16.mxu1 %v3490_v13  ;;  %1847 = vmatprep.mubr.bf16.mxu0 %v3496_v14  ;;  %v3586_v13 = vld [vmem:[%s5529_s0 + $0x324] ss:$28 sps:$4 sm:$0xff]   ;;  %v3582_v14 = vld [vmem:[%s5529_s0 + $0x318] ss:$28 sps:$4 sm:$0xff]  }
  0x8c   :  { %1993 = vmatpush1.bf16.msra.mxu1 %v3508_v15  ;;  %v3588_v15 = vld [vmem:[%s5529_s0 + $0x320] ss:$28 sps:$4 sm:$0xff]  }
  0x8d   :  { %1994 = vmatprep.subr.bf16.mxu1 %v3525_v16  ;;  %v3589_v16 = vld [vmem:[%s5529_s0 + $0x354] ss:$28 sps:$4 sm:$0xff]  }
  0x90   :  { %1995 = vmatpush1.bf16.msra.mxu1 %v3523_v17  ;;  %v3592_v17 = vld [vmem:[%s5529_s0 + $0x35c] ss:$28 sps:$4 sm:$0xff]  }
  0x91   :  { %1996 = vmatprep.subr.bf16.mxu1 %v3540_v20  ;;  %v263_v20 = vlaneseq }
  0x92   :  { %1655 = vmatmul.mubr.bf16.gmra.mxu1 %v3492_v18  ;;  %1848 = vmatmul.mubr.bf16.gmra.mxu0 %v3498_v19  ;;  %v3613_v18 = vld [vmem:[%s5530_s3 + $0x68] sm:$0xff]  }
  0x93   :  { %1664 = vmatprep.mubr.bf16.mxu1 %v3499_v21  ;;  %1857 = vmatprep.mubr.bf16.mxu0 %v3502_v22  ;;  %v3614_v19 = vld [vmem:[%s5530_s3 + $0x28] sm:$0xff]   ;;  %v3594_v22 = vld [vmem:[%s5529_s0 + $0x358] ss:$28 sps:$4 sm:$0xff]  }
  0x94   :  { %1997 = vmatpush1.bf16.msra.mxu1 %v3538_v23  ;;  %3142 = vmatprep.subr.bf16.mxu0 %v3613_v18  ;;  %v3591_v21 = vld [vmem:[%s5529_s0 + $0x350] ss:$28 sps:$4 sm:$0xff]   ;;  %v264_v23 = vshrl.u32 %v263_v20, 7  ;;  %v3599_v18 = vld [vmem:[%s5529_s0 + $0xf8] ss:$28 sps:$4 sm:$0xff]  }
  0x95   :  { %1998 = vmatprep.subr.bf16.mxu1 %v3555_v24  ;;  %3143 = vmatpush3.bf16.msra.mxu0 %v3614_v19  ;;  %v5534_v24 = vmov 0  }
  0x98   :  { %1999 = vmatpush1.bf16.msra.mxu1 %v3553_v25  ;;  %v265_v25 = vsub.s32 0, %v264_v23 }
  0x99   :  { %2000 = vmatprep.subr.bf16.mxu1 %v3570_v26  ;;  %v261_v26 = vld [vmem:[%s5531_s2] sm:$0x3] }
  0x9a   :  { %1665 = vmatmul.mubr.bf16.gmra.mxu1 %v3501_v27  ;;  %1858 = vmatmul.mubr.bf16.gmra.mxu0 %v3504_v28  ;;  %v269_v27 = vsub.s32 1, %v264_v23  ;;  %v3595_v28 = vld [vmem:[%s5529_s0 + $0x18] ss:$28 sps:$4 sm:$0xff]  }
  0x9b   :  { %1674 = vmatprep.mubr.bf16.mxu1 %v3505_v29  ;;  %1867 = vmatprep.mubr.bf16.mxu0 %v3511_v30  ;;  %v4435_v29 = vrot.slane %v261_v26, %v265_v25  ;;  %v3621_v23 = vld [vmem:[%s5530_s3 + $0x50] sm:$0xff]  }
  0x9c   :  { %2001 = vmatpush1.bf16.msra.mxu1 %v3568_v31  ;;  %v4437_v30 = vrot.slane %v261_v26, %v269_v27  ;;  %v3617_v31 = vld [vmem:[%s5530_s3 + $0x60] sm:$0xff]   ;;  %v3622_v25 = vld [vmem:[%s5530_s3 + $0x10] sm:$0xff]  }
  0x9d   :  { %2002 = vmatprep.subr.bf16.mxu1 %v3585_v32  ;;  %v3618_v32 = vld [vmem:[%s5530_s3 + $0x20] sm:$0xff]   ;;  %3144 = vmatprep.subr.bf16.mxu0 %v3617_v31 }
  0x9e   :  { %3145 = vmatpush3.bf16.msra.mxu0 %v3618_v32 }
  0xa0   :  { %2003 = vmatpush1.bf16.msra.mxu1 %v3583_v33 }
  0xa2   :  { %1675 = vmatmul.mubr.bf16.gmra.mxu1 %v3507_v34  ;;  %1868 = vmatmul.mubr.bf16.gmra.mxu0 %v3513_v35 }
  0xa3   :  { %1684 = vmatprep.mubr.bf16.mxu1 %v3514_v36  ;;  %1877 = vmatprep.mubr.bf16.mxu0 %v3517_v37 }
  0xaa   :  { %1685 = vmatmul.mubr.bf16.gmra.mxu1 %v3516_v38  ;;  %1878 = vmatmul.mubr.bf16.gmra.mxu0 %v3519_v39 }
  0xab   :  { %1694 = vmatprep.mubr.bf16.mxu1 %v3520_v40  ;;  %1887 = vmatprep.mubr.bf16.mxu0 %v3526_v41  ;;  %v3596_v41 = vld [vmem:[%s5529_s0 + $0x50] ss:$28 sps:$4 sm:$0xff]  }
  0xb2   :  { %1695 = vmatmul.mubr.bf16.gmra.mxu1 %v3522_v42  ;;  %1888 = vmatmul.mubr.bf16.gmra.mxu0 %v3528_v43 }
  0xb3   :  { %1704 = vmatprep.mubr.bf16.mxu1 %v3529_v44  ;;  %1897 = vmatprep.mubr.bf16.mxu0 %v3532_v45 }
  0xba   :  { %1705 = vmatmul.mubr.bf16.gmra.mxu1 %v3531_v46  ;;  %1898 = vmatmul.mubr.bf16.gmra.mxu0 %v3534_v47 }
  0xbb   :  { %1714 = vmatprep.mubr.bf16.mxu1 %v3535_v48  ;;  %1907 = vmatprep.mubr.bf16.mxu0 %v3541_v49 }
  0xc2   :  { %1715 = vmatmul.mubr.bf16.gmra.mxu1 %v3537_v50  ;;  %1908 = vmatmul.mubr.bf16.gmra.mxu0 %v3543_v51 }
  0xc3   :  { %1724 = vmatprep.mubr.bf16.mxu1 %v3544_v52  ;;  %1917 = vmatprep.mubr.bf16.mxu0 %v3547_v53 }
  0xca   :  { %1725 = vmatmul.mubr.bf16.gmra.mxu1 %v3546_v54  ;;  %1918 = vmatmul.mubr.bf16.gmra.mxu0 %v3549_v55  ;;  %v3597_v54 = vld [vmem:[%s5529_s0 + $0x88] ss:$28 sps:$4 sm:$0xff]  }
  0xcb   :  { %1734 = vmatprep.mubr.bf16.mxu1 %v3550_v56  ;;  %1927 = vmatprep.mubr.bf16.mxu0 %v3556_v57 }
  0xd2   :  { %1735 = vmatmul.mubr.bf16.gmra.mxu1 %v3552_v58  ;;  %1928 = vmatmul.mubr.bf16.gmra.mxu0 %v3558_v59  ;;  %v3619_v59 = vld [vmem:[%s5530_s3 + $0x58] sm:$0xff]  }
  0xd3   :  { %1744 = vmatprep.mubr.bf16.mxu1 %v3559_v60  ;;  %1937 = vmatprep.mubr.bf16.mxu0 %v3562_v61  ;;  %v3620_v60 = vld [vmem:[%s5530_s3 + $0x18] sm:$0xff]  }
  0xd4   :  { %3146 = vmatprep.subr.bf16.mxu0 %v3619_v59 }
  0xd5   :  { %3147 = vmatpush3.bf16.msra.mxu0 %v3620_v60 }
  0xd6   :  { %3148 = vmatprep.subr.bf16.mxu0 %v3621_v23  ;;  %v3624_v23 = vld [vmem:[%s5530_s3 + $0x8] sm:$0xff]  }
  0xd9   :  { %3149 = vmatpush3.bf16.msra.mxu0 %v3622_v25 }
  0xda   :  { %1745 = vmatmul.mubr.bf16.gmra.mxu1 %v3561_v0  ;;  %1938 = vmatmul.mubr.bf16.gmra.mxu0 %v3564_v1 }
  0xdb   :  { %1754 = vmatprep.mubr.bf16.mxu1 %v3565_v2  ;;  %1947 = vmatprep.mubr.bf16.mxu0 %v3571_v3 }
  0xe2   :  { %1755 = vmatmul.mubr.bf16.gmra.mxu1 %v3567_v4  ;;  %1948 = vmatmul.mubr.bf16.gmra.mxu0 %v3573_v5  ;;  %v3598_v5 = vld [vmem:[%s5529_s0 + $0xc0] ss:$28 sps:$4 sm:$0xff]  }
  0xe3   :  { %1764 = vmatprep.mubr.bf16.mxu1 %v3574_v6  ;;  %1957 = vmatprep.mubr.bf16.mxu0 %v3577_v7 }
  0xea   :  { %1765 = vmatmul.mubr.bf16.gmra.mxu1 %v3576_v10  ;;  %1958 = vmatmul.mubr.bf16.gmra.mxu0 %v3579_v11 }
  0xeb   :  { %1774 = vmatprep.mubr.bf16.mxu1 %v3580_v12  ;;  %1967 = vmatprep.mubr.bf16.mxu0 %v3586_v13 }
  0xf2   :  { %1775 = vmatmul.mubr.bf16.gmra.mxu1 %v3582_v14  ;;  %1968 = vmatmul.mubr.bf16.gmra.mxu0 %v3588_v15 }
  0xf3   :  { %1784 = vmatprep.mubr.bf16.mxu1 %v3589_v16  ;;  %1977 = vmatprep.mubr.bf16.mxu0 %v3592_v17 }
  0xfa   :  { %1785 = vmatmul.mubr.bf16.gmra.mxu1 %v3591_v21  ;;  %1978 = vmatmul.mubr.bf16.gmra.mxu0 %v3594_v22 }
  0xfb   :  { %2020 = vmatprep.mubr.bf16.mxu1 %v5534_v24 }
 0x102   :  { %v1523_v33 = vpop.f32.mrf.mxu1  ;;  %2021 = vmatmul.mubr.bf16.vlgmr.msra.gmra.mxu1 %v3595_v28  ;;  %v4445_v34 = vpop.f32.mrf.mxu0 }
 0x103   :  { %v4448_v35 = vadd.f32 %v1523_v33, %v4435_v29  ;;  %2030 = vmatprep.mubr.bf16.mxu1 %v5534_v24 }
 0x104   :  { %v1525_v36 = vpop.f32.mrf.mxu1  ;;  %v4451_v37 = vpop.f32.mrf.mxu0 }
 0x105   :  { %v4454_v38 = vadd.f32 %v1525_v36, %v4437_v30 }
 0x106   :  { %v1527_v39 = vpop.f32.mrf.mxu1  ;;  %v4456_v40 = vpop.f32.mrf.mxu0 }
 0x107   :  { %v4462_v42 = vadd.f32 %v1527_v39, %v4435_v29 }
 0x108   :  { %v1529_v43 = vpop.f32.mrf.mxu1  ;;  %v4464_v44 = vpop.f32.mrf.mxu0 }
 0x109   :  { %v4467_v45 = vadd.f32 %v1529_v43, %v4437_v30 }
 0x10a   :  { %v1533_v46 = vpop.f32.mrf.mxu1  ;;  %2031 = vmatmul.mubr.bf16.gmra.mxu1 %v3596_v41  ;;  %v4469_v47 = vpop.f32.mrf.mxu0  ;;  %v3600_v41 = vld [vmem:[%s5529_s0 + $0x130] ss:$28 sps:$4 sm:$0xff]  }
 0x10b   :  { %v4472_v48 = vadd.f32 %v1533_v46, %v4435_v29  ;;  %2040 = vmatprep.mubr.bf16.mxu1 %v5534_v24 }
 0x10c   :  { %v1535_v49 = vpop.f32.mrf.mxu1  ;;  %v4475_v50 = vpop.f32.mrf.mxu0 }
 0x10d   :  { %v4478_v51 = vadd.f32 %v1535_v49, %v4437_v30 }
 0x10e   :  { %v1537_v52 = vpop.f32.mrf.mxu1  ;;  %v4480_v53 = vpop.f32.mrf.mxu0 }
 0x10f   :  { %5536 = vst [vmem:[#allocation2_spill] sm:$0xff] %v4480_v53  ;;  %v4486_v55 = vadd.f32 %v1537_v52, %v4435_v29  ;;  %v3604_v53 = vld [vmem:[%s5529_s0 + $0x210] ss:$28 sps:$4 sm:$0xff]  }
 0x110   :  { %v1539_v56 = vpop.f32.mrf.mxu1  ;;  %v4488_v57 = vpop.f32.mrf.mxu0 }
 0x111   :  { %5537 = vst [vmem:[#allocation3_spill] sm:$0xff] %v4488_v57  ;;  %v4491_v58 = vadd.f32 %v1539_v56, %v4437_v30 }
 0x112   :  { %v1543_v61 = vpop.f32.mrf.mxu1  ;;  %2041 = vmatmul.mubr.bf16.gmra.mxu1 %v3597_v54  ;;  %v4499_v62 = vpop.f32.mrf.mxu0 }
 0x113   :  { %v4502_v63 = vadd.f32 %v1543_v61, %v4435_v29  ;;  %2050 = vmatprep.mubr.bf16.mxu1 %v5534_v24 }
 0x114   :  { %v1545_v0 = vpop.f32.mrf.mxu1  ;;  %v4505_v1 = vpop.f32.mrf.mxu0 }
 0x115   :  { %v4508_v2 = vadd.f32 %v1545_v0, %v4437_v30 }
 0x116   :  { %v1547_v3 = vpop.f32.mrf.mxu1  ;;  %v4510_v4 = vpop.f32.mrf.mxu0 }
 0x117   :  { %5538 = vst [vmem:[#allocation4_spill] sm:$0xff] %v4510_v4  ;;  %v4516_v6 = vadd.f32 %v1547_v3, %v4435_v29 }
 0x118   :  { %v1549_v7 = vpop.f32.mrf.mxu1  ;;  %v4518_v8 = vpop.f32.mrf.mxu0 }
 0x119   :  { %5539 = vst [vmem:[#allocation5_spill] sm:$0xff] %v4518_v8  ;;  %v4521_v9 = vadd.f32 %v1549_v7, %v4437_v30  ;;  %v3601_v7 = vld [vmem:[%s5529_s0 + $0x168] ss:$28 sps:$4 sm:$0xff]  }
 0x11a   :  { %v1553_v10 = vpop.f32.mrf.mxu1  ;;  %2051 = vmatmul.mubr.bf16.gmra.mxu1 %v3598_v5  ;;  %v4523_v11 = vpop.f32.mrf.mxu0 }
 0x11b   :  { %v4526_v12 = vadd.f32 %v1553_v10, %v4435_v29  ;;  %2060 = vmatprep.mubr.bf16.mxu1 %v5534_v24 }
 0x11c   :  { %v1555_v13 = vpop.f32.mrf.mxu1  ;;  %v4529_v14 = vpop.f32.mrf.mxu0 }
 0x11d   :  { %v4532_v15 = vadd.f32 %v1555_v13, %v4437_v30 }
 0x11e   :  { %v1557_v16 = vpop.f32.mrf.mxu1  ;;  %v4534_v17 = vpop.f32.mrf.mxu0 }
 0x11f   :  { %5540 = vst [vmem:[#allocation6_spill] sm:$0xff] %v4534_v17  ;;  %v4540_v19 = vadd.f32 %v1557_v16, %v4435_v29 }
 0x120   :  { %v1559_v20 = vpop.f32.mrf.mxu1  ;;  %v4542_v21 = vpop.f32.mrf.mxu0 }
 0x121   :  { %5541 = vst [vmem:[#allocation7_spill] sm:$0xff] %v4542_v21  ;;  %v4545_v22 = vadd.f32 %v1559_v20, %v4437_v30  ;;  %v3623_v20 = vld [vmem:[%s5530_s3 + $0x48] sm:$0xff]  }
 0x122   :  { %v1563_v26 = vpop.f32.mrf.mxu1  ;;  %2061 = vmatmul.mubr.bf16.gmra.mxu1 %v3599_v18  ;;  %v4553_v27 = vpop.f32.mrf.mxu0  ;;  %3150 = vmatprep.subr.bf16.mxu0 %v3623_v20 }
 0x123   :  { %v4556_v28 = vadd.f32 %v1563_v26, %v4435_v29  ;;  %2070 = vmatprep.mubr.bf16.mxu1 %v5534_v24  ;;  %3151 = vmatpush3.bf16.msra.mxu0 %v3624_v23 }
 0x124   :  { %v1565_v31 = vpop.f32.mrf.mxu1  ;;  %v4559_v32 = vpop.f32.mrf.mxu0 }
 0x125   :  { %v4562_v33 = vadd.f32 %v1565_v31, %v4437_v30 }
 0x126   :  { %v1567_v36 = vpop.f32.mrf.mxu1  ;;  %v4564_v39 = vpop.f32.mrf.mxu0 }
 0x127   :  { %5542 = vst [vmem:[#allocation8_spill] sm:$0xff] %v4564_v39  ;;  %v4570_v43 = vadd.f32 %v1567_v36, %v4435_v29 }
 0x128   :  { %v1569_v46 = vpop.f32.mrf.mxu1  ;;  %v4572_v49 = vpop.f32.mrf.mxu0 }
 0x129   :  { %5543 = vst [vmem:[#allocation9_spill] sm:$0xff] %v4572_v49  ;;  %v4575_v52 = vadd.f32 %v1569_v46, %v4437_v30 }
 0x12a   :  { %v1573_v54 = vpop.f32.mrf.mxu1  ;;  %2071 = vmatmul.mubr.bf16.gmra.mxu1 %v3600_v41  ;;  %v4577_v56 = vpop.f32.mrf.mxu0 }
 0x12b   :  { %v4580_v59 = vadd.f32 %v1573_v54, %v4435_v29  ;;  %2080 = vmatprep.mubr.bf16.mxu1 %v5534_v24 }
 0x12c   :  { %v1575_v60 = vpop.f32.mrf.mxu1  ;;  %v4583_v61 = vpop.f32.mrf.mxu0 }
 0x12d   :  { %v4586_v0 = vadd.f32 %v1575_v60, %v4437_v30 }
 0x12e   :  { %v1577_v3 = vpop.f32.mrf.mxu1  ;;  %v4588_v5 = vpop.f32.mrf.mxu0 }
 0x12f   :  { %5544 = vst [vmem:[#allocation10_spill] sm:$0xff] %v4588_v5  ;;  %v4594_v10 = vadd.f32 %v1577_v3, %v4435_v29  ;;  %v3602_v3 = vld [vmem:[%s5529_s0 + $0x1a0] ss:$28 sps:$4 sm:$0xff]  }
 0x130   :  { %v1579_v13 = vpop.f32.mrf.mxu1  ;;  %v4596_v16 = vpop.f32.mrf.mxu0 }
 0x131   :  { %5545 = vst [vmem:[#allocation11_spill] sm:$0xff] %v4596_v16  ;;  %v4599_v18 = vadd.f32 %v1579_v13, %v4437_v30 }
 0x132   :  { %v1583_v25 = vpop.f32.mrf.mxu1  ;;  %2081 = vmatmul.mubr.bf16.gmra.mxu1 %v3601_v7  ;;  %v4607_v26 = vpop.f32.mrf.mxu0 }
 0x133   :  { %v4610_v31 = vadd.f32 %v1583_v25, %v4435_v29  ;;  %2090 = vmatprep.mubr.bf16.mxu1 %v5534_v24 }
 0x134   :  { %v1585_v36 = vpop.f32.mrf.mxu1  ;;  %v4613_v41 = vpop.f32.mrf.mxu0 }
 0x135   :  { %v4616_v46 = vadd.f32 %v1585_v36, %v4437_v30 }
 0x136   :  { %v1587_v54 = vpop.f32.mrf.mxu1  ;;  %v4618_v60 = vpop.f32.mrf.mxu0 }
 0x137   :  { %5546 = vst [vmem:[#allocation12_spill] sm:$0xff] %v4618_v60  ;;  %v4624_v7 = vadd.f32 %v1587_v54, %v4435_v29  ;;  %v5548_v60 = vmov 0  }
 0x138   :  { %v1589_v13 = vpop.f32.mrf.mxu1  ;;  %v4626_v25 = vpop.f32.mrf.mxu0 }
 0x139   :  { %5547 = vst [vmem:[#allocation13_spill] sm:$0xff] %v4626_v25  ;;  %v4629_v20 = vadd.f32 %v1589_v13, %v4437_v30  ;;  %v1444_v13 = vadd.f32 %v4445_v34, %v4435_v29  ;;  %v3626_v34 = vld [vmem:[%s5530_s3] sm:$0xff]  }
 0x13a   :  { %v1593_v23 = vpop.f32.mrf.mxu1  ;;  %2091 = vmatmul.mubr.bf16.gmra.mxu1 %v3602_v3  ;;  %v4631_v36 = vpop.f32.mrf.mxu0  ;;  %v3603_v3 = vld [vmem:[%s5529_s0 + $0x1d8] ss:$28 sps:$4 sm:$0xff]  }
 0x13b   :  { %v4634_v24 = vadd.f32 %v1593_v23, %v4435_v29  ;;  %2100 = vmatprep.mubr.bf16.mxu1 %v5548_v60 }
 0x13c   :  { %v1595_v16 = vpop.f32.mrf.mxu1  ;;  %v4637_v5 = vpop.f32.mrf.mxu0 }
 0x13d   :  { %v4640_v54 = vadd.f32 %v1595_v16, %v4437_v30  ;;  %v1446_v16 = vadd.f32 %v4451_v37, %v4437_v30 }
 0x13e   :  { %v1597_v49 = vpop.f32.mrf.mxu1  ;;  %v4642_v25 = vpop.f32.mrf.mxu0 }
 0x13f   :  { %5549 = vst [vmem:[#allocation14_spill] sm:$0xff] %v4642_v25  ;;  %v4650_v23 = vadd.f32 %v1597_v49, %v4435_v29  ;;  %v3625_v25 = vld [vmem:[%s5530_s3 + $0x40] sm:$0xff]  }
 0x140   :  { %v1599_v39 = vpop.f32.mrf.mxu1  ;;  %v4652_v21 = vpop.f32.mrf.mxu0  ;;  %3152 = vmatprep.subr.bf16.mxu0 %v3625_v25  ;;  %v1456_v25 = vadd.f32 %v4475_v50, %v4437_v30  ;;  %v1464_v50 = vadd.f32 %v4499_v62, %v4435_v29  ;;  %v3608_v62 = vld [vmem:[%s5529_s0 + $0x280] ss:$28 sps:$4 sm:$0xff]  }
 0x141   :  { %5550 = vst [vmem:[#allocation15_spill] sm:$0xff] %v4652_v21  ;;  %v4657_v17 = vadd.f32 %v1599_v39, %v4437_v30  ;;  %3153 = vmatpush3.bf16.msra.mxu0 %v3626_v34 }
 0x142   :  { %v1636_v8 = vpop.f32.mrf.mxu1  ;;  %2101 = vmatmul.mubr.bf16.gmra.mxu1 %v3603_v3  ;;  %v4665_v49 = vpop.f32.mrf.mxu0  ;;  %v1454_v3 = vadd.f32 %v4469_v47, %v4435_v29  ;;  %v3607_v47 = vld [vmem:[%s5529_s0 + $0x248] ss:$28 sps:$4 sm:$0xff]  }
 0x143   :  { %5551 = vst [vmem:[#allocation16_spill] sm:$0xff] %v4665_v49  ;;  %v4667_v4 = vadd.f32 %v1636_v8, %v1444_v13  ;;  %2110 = vmatprep.mubr.bf16.mxu1 %v5548_v60 }
 0x144   :  { %v1638_v37 = vpop.f32.mrf.mxu1  ;;  %v4670_v39 = vpop.f32.mrf.mxu0 }
 0x145   :  { %5552 = vst [vmem:[#allocation17_spill] sm:$0xff] %v4670_v39  ;;  %v4672_v21 = vadd.f32 %v1638_v37, %v1446_v16 }
 0x146   :  { %v4674_v57 = vpop.f32.mrf.mxu1  ;;  %v4683_v13 = vpop.f32.mrf.mxu0 }
 0x147   :  { %5553 = vst [vmem:[#allocation18_spill] sm:$0xff] %v4672_v21  ;;  %5554 = vst [vmem:[#allocation19_spill] sm:$0xff] %v4683_v13 }
 0x148   :  { %v4681_v8 = vpop.f32.mrf.mxu1  ;;  %v4690_v34 = vpop.f32.mrf.mxu0 }
 0x14a   :  { %v1646_v39 = vpop.f32.mrf.mxu1  ;;  %2111 = vmatmul.mubr.bf16.gmra.mxu1 %v3604_v53  ;;  %v4701_v13 = vpop.f32.mrf.mxu0 }
 0x14b   :  { %v4687_v16 = vadd.f32 %v1646_v39, %v1454_v3  ;;  %2120 = vmatprep.mubr.bf16.mxu1 %v5548_v60  ;;  %v1466_v39 = vadd.f32 %v4505_v1, %v4437_v30  ;;  %v1474_v1 = vadd.f32 %v4523_v11, %v4435_v29  ;;  %v3611_v11 = vld [vmem:[%s5529_s0 + $0x2b8] ss:$28 sps:$4 sm:$0xff]  }
 0x14c   :  { %v1648_v37 = vpop.f32.mrf.mxu1 }
 0x14d   :  { %5555 = vst [vmem:[#allocation20_spill] sm:$0xff] %v4687_v16  ;;  %v4692_v21 = vadd.f32 %v1648_v37, %v1456_v25  ;;  %v4710_v37 = vpop.f32.mrf.mxu0 }
 0x14e   :  { %v4694_v49 = vpop.f32.mrf.mxu1 }
 0x14f   :  { %5556 = vst [vmem:[#allocation21_spill] sm:$0xff] %v4692_v21  ;;  %5557 = vst [vmem:[#allocation22_spill] sm:$0xff] %v4694_v49 }
 0x150   :  { %v4703_v53 = vpop.f32.mrf.mxu1 }
 0x151   :  { %5558 = vst [vmem:[#allocation23_spill] sm:$0xff] %v4703_v53  ;;  %v4721_v53 = vpop.f32.mrf.mxu0 }
 0x152   :  { %v1656_v3 = vpop.f32.mrf.mxu1  ;;  %2121 = vmatmul.mubr.bf16.gmra.mxu1 %v3607_v47 }
 0x153   :  { %v4707_v25 = vadd.f32 %v1656_v3, %v1464_v50  ;;  %2130 = vmatprep.mubr.bf16.mxu1 %v5548_v60  ;;  %v1476_v50 = vadd.f32 %v4529_v14, %v4437_v30  ;;  %v1484_v14 = vadd.f32 %v4553_v27, %v4435_v29  ;;  %v3612_v27 = vld [vmem:[%s5529_s0 + $0x2f0] ss:$28 sps:$4 sm:$0xff]  }
 0x154   :  { %v1658_v21 = vpop.f32.mrf.mxu1 }
 0x155   :  { %5559 = vst [vmem:[#allocation24_spill] sm:$0xff] %v4707_v25  ;;  %v4712_v16 = vadd.f32 %v1658_v21, %v1466_v39  ;;  %v4730_v39 = vpop.f32.mrf.mxu0 }
 0x156   :  { %v4714_v49 = vpop.f32.mrf.mxu1 }
 0x157   :  { %5560 = vst [vmem:[#allocation25_spill] sm:$0xff] %v4712_v16  ;;  %5561 = vst [vmem:[#allocation26_spill] sm:$0xff] %v4714_v49 }
 0x158   :  { %v4723_v47 = vpop.f32.mrf.mxu1 }
 0x159   :  { %5562 = vst [vmem:[#allocation27_spill] sm:$0xff] %v4723_v47  ;;  %v4741_v47 = vpop.f32.mrf.mxu0 }
 0x15a   :  { %v1666_v3 = vpop.f32.mrf.mxu1  ;;  %2131 = vmatmul.mubr.bf16.gmra.mxu1 %v3608_v62 }
 0x15b   :  { %v4727_v21 = vadd.f32 %v1666_v3, %v1474_v1  ;;  %2140 = vmatprep.mubr.bf16.mxu1 %v5548_v60  ;;  %v1486_v1 = vadd.f32 %v4559_v32, %v4437_v30  ;;  %v1494_v32 = vadd.f32 %v4577_v56, %v4435_v29  ;;  %v3615_v56 = vld [vmem:[%s5529_s0 + $0x328] ss:$28 sps:$4 sm:$0xff]  }
 0x15c   :  { %v1668_v16 = vpop.f32.mrf.mxu1 }
 0x15d   :  { %5563 = vst [vmem:[#allocation28_spill] sm:$0xff] %v4727_v21  ;;  %v4732_v25 = vadd.f32 %v1668_v16, %v1476_v50  ;;  %v4750_v50 = vpop.f32.mrf.mxu0 }
 0x15e   :  { %v4734_v49 = vpop.f32.mrf.mxu1 }
 0x15f   :  { %5564 = vst [vmem:[#allocation29_spill] sm:$0xff] %v4732_v25  ;;  %5565 = vst [vmem:[#allocation30_spill] sm:$0xff] %v4734_v49 }
 0x160   :  { %v4743_v62 = vpop.f32.mrf.mxu1 }
 0x161   :  { %5566 = vst [vmem:[#allocation31_spill] sm:$0xff] %v4743_v62  ;;  %v4761_v62 = vpop.f32.mrf.mxu0 }
 0x162   :  { %v1676_v3 = vpop.f32.mrf.mxu1  ;;  %2141 = vmatmul.mubr.bf16.gmra.mxu1 %v3611_v11 }
 0x163   :  { %v4747_v16 = vadd.f32 %v1676_v3, %v1484_v14  ;;  %2150 = vmatprep.mubr.bf16.mxu1 %v5548_v60  ;;  %v1496_v14 = vadd.f32 %v4583_v61, %v4437_v30  ;;  %v1504_v61 = vadd.f32 %v4607_v26, %v4435_v29  ;;  %v3616_v26 = vld [vmem:[%s5529_s0 + $0x360] ss:$28 sps:$4 sm:$0xff]  }
 0x164   :  { %v1678_v25 = vpop.f32.mrf.mxu1 }
 0x165   :  { %5567 = vst [vmem:[#allocation32_spill] sm:$0xff] %v4747_v16  ;;  %v4752_v21 = vadd.f32 %v1678_v25, %v1486_v1  ;;  %v4770_v1 = vpop.f32.mrf.mxu0 }
 0x166   :  { %v4754_v49 = vpop.f32.mrf.mxu1 }
 0x167   :  { %5568 = vst [vmem:[#allocation33_spill] sm:$0xff] %v4752_v21  ;;  %5569 = vst [vmem:[#allocation34_spill] sm:$0xff] %v4754_v49 }
 0x168   :  { %v4763_v11 = vpop.f32.mrf.mxu1 }
 0x169   :  { %5570 = vst [vmem:[#allocation35_spill] sm:$0xff] %v4763_v11  ;;  %v4781_v11 = vpop.f32.mrf.mxu0 }
 0x16a   :  { %v1686_v3 = vpop.f32.mrf.mxu1  ;;  %2151 = vmatmul.mubr.bf16.gmra.mxu1 %v3612_v27 }
 0x16b   :  { %v4767_v25 = vadd.f32 %v1686_v3, %v1494_v32  ;;  %2160 = vmatprep.mubr.bf16.mxu1 %v5548_v60  ;;  %v1506_v32 = vadd.f32 %v4613_v41, %v4437_v30  ;;  %v1514_v41 = vadd.f32 %v4631_v36, %v4435_v29 }
 0x16c   :  { %v1688_v21 = vpop.f32.mrf.mxu1 }
 0x16d   :  { %5571 = vst [vmem:[#allocation36_spill] sm:$0xff] %v4767_v25  ;;  %v4772_v16 = vadd.f32 %v1688_v21, %v1496_v14  ;;  %v4790_v14 = vpop.f32.mrf.mxu0 }
 0x16e   :  { %v4774_v49 = vpop.f32.mrf.mxu1 }
 0x16f   :  { %5572 = vst [vmem:[#allocation37_spill] sm:$0xff] %v4772_v16  ;;  %5573 = vst [vmem:[#allocation38_spill] sm:$0xff] %v4774_v49 }
 0x170   :  { %v4783_v27 = vpop.f32.mrf.mxu1 }
 0x171   :  { %5574 = vst [vmem:[#allocation39_spill] sm:$0xff] %v4783_v27  ;;  %v4801_v27 = vpop.f32.mrf.mxu0 }
 0x172   :  { %v1696_v3 = vpop.f32.mrf.mxu1  ;;  %2161 = vmatmul.mubr.bf16.gmra.mxu1 %v3615_v56  ;;  %5578 = vst [vmem:[#allocation43_spill] sm:$0xff] %v4801_v27 }
 0x173   :  { %v4787_v21 = vadd.f32 %v1696_v3, %v1504_v61  ;;  %2170 = vmatprep.mubr.bf16.mxu1 %v5548_v60  ;;  %v1516_v60 = vadd.f32 %v4637_v5, %v4437_v30 }
 0x174   :  { %v1698_v16 = vpop.f32.mrf.mxu1 }
 0x175   :  { %5575 = vst [vmem:[#allocation40_spill] sm:$0xff] %v4787_v21  ;;  %v4792_v25 = vadd.f32 %v1698_v16, %v1506_v32  ;;  %v4809_v32 = vpop.f32.mrf.mxu0 }
 0x176   :  { %v4794_v49 = vpop.f32.mrf.mxu1 }
 0x177   :  { %5576 = vst [vmem:[#allocation41_spill] sm:$0xff] %v4792_v25  ;;  %5577 = vst [vmem:[#allocation42_spill] sm:$0xff] %v4794_v49  ;;  %v4815_v49 = vpop.f32.mrf.mxu0 }
 0x178   :  { %v4803_v56 = vpop.f32.mrf.mxu1 }
 0x179   :  { %5579 = vst [vmem:[#allocation44_spill] sm:$0xff] %v4803_v56  ;;  %v4822_v5 = vpop.f32.mrf.mxu0 }
 0x17a   :  { %v1706_v61 = vpop.f32.mrf.mxu1  ;;  %2171 = vmatmul.mubr.bf16.gmra.mxu1 %v3616_v26 }
 0x17b   :  { %v4807_v16 = vadd.f32 %v1706_v61, %v1514_v41 }
 0x17c   :  { %v1708_v3 = vpop.f32.mrf.mxu1 }
 0x17d   :  { %5580 = vst [vmem:[#allocation45_spill] sm:$0xff] %v4807_v16  ;;  %v4811_v25 = vadd.f32 %v1708_v3, %v1516_v60  ;;  %v4830_v3 = vpop.f32.mrf.mxu0 }
 0x17e   :  { %v4813_v21 = vpop.f32.mrf.mxu1 }
 0x17f   :  { %5581 = vst [vmem:[#allocation46_spill] sm:$0xff] %v4811_v25 }
 0x180   :  { %v4817_v36 = vpop.f32.mrf.mxu1 }
 0x181   :  { %5582 = vst [vmem:[#allocation47_spill] sm:$0xff] %v4817_v36 }
 0x182   :  { %v1716_v27 = vpop.f32.mrf.mxu1 }
 0x183   :  { %v4820_v56 = vadd.f32 %v1716_v27, %v4448_v35  ;;  %v4838_v27 = vpop.f32.mrf.mxu0 }
 0x184   :  { %v1718_v26 = vpop.f32.mrf.mxu1 }
 0x185   :  { %5583 = vst [vmem:[#allocation48_spill] sm:$0xff] %v4820_v56  ;;  %v4825_v41 = vadd.f32 %v1718_v26, %v4454_v38 }
 0x186   :  { %v1720_v61 = vpop.f32.mrf.mxu1 }
 0x187   :  { %v4828_v60 = vadd.f32 %v1720_v61, %v4462_v42  ;;  %v4846_v61 = vpop.f32.mrf.mxu0 }
 0x188   :  { %v1722_v25 = vpop.f32.mrf.mxu1 }
 0x189   :  { %5584 = vst [vmem:[#allocation49_spill] sm:$0xff] %v4828_v60  ;;  %v4833_v16 = vadd.f32 %v1722_v25, %v4467_v45 }
 0x18a   :  { %v1726_v36 = vpop.f32.mrf.mxu1 }
 0x18b   :  { %v4836_v35 = vadd.f32 %v1726_v36, %v4472_v48  ;;  %v4854_v36 = vpop.f32.mrf.mxu0 }
 0x18c   :  { %v1728_v56 = vpop.f32.mrf.mxu1 }
 0x18d   :  { %5585 = vst [vmem:[#allocation50_spill] sm:$0xff] %v4836_v35  ;;  %v4841_v38 = vadd.f32 %v1728_v56, %v4478_v51 }
 0x18e   :  { %v1730_v26 = vpop.f32.mrf.mxu1 }
 0x18f   :  { %v4844_v42 = vadd.f32 %v1730_v26, %v4486_v55  ;;  %v4862_v26 = vpop.f32.mrf.mxu0 }
 0x190   :  { %v1732_v60 = vpop.f32.mrf.mxu1 }
 0x191   :  { %5586 = vst [vmem:[#allocation51_spill] sm:$0xff] %v4844_v42  ;;  %v4849_v45 = vadd.f32 %v1732_v60, %v4491_v58 }
 0x192   :  { %v1736_v25 = vpop.f32.mrf.mxu1 }
 0x193   :  { %v4852_v48 = vadd.f32 %v1736_v25, %v4502_v63  ;;  %v4870_v25 = vpop.f32.mrf.mxu0 }
 0x194   :  { %v1738_v35 = vpop.f32.mrf.mxu1 }
 0x195   :  { %5587 = vst [vmem:[#allocation52_spill] sm:$0xff] %v4852_v48  ;;  %v4857_v51 = vadd.f32 %v1738_v35, %v4508_v2 }
 0x196   :  { %v1740_v56 = vpop.f32.mrf.mxu1 }
 0x197   :  { %v4860_v55 = vadd.f32 %v1740_v56, %v4516_v6  ;;  %v4878_v56 = vpop.f32.mrf.mxu0 }
 0x198   :  { %v1742_v42 = vpop.f32.mrf.mxu1 }
 0x199   :  { %5588 = vst [vmem:[#allocation53_spill] sm:$0xff] %v4860_v55  ;;  %v4865_v58 = vadd.f32 %v1742_v42, %v4521_v9 }
 0x19a   :  { %v1746_v60 = vpop.f32.mrf.mxu1 }
 0x19b   :  { %5589 = vst [vmem:[#allocation54_spill] sm:$0xff] %v4865_v58  ;;  %v4868_v63 = vadd.f32 %v1746_v60, %v4526_v12  ;;  %v4886_v60 = vpop.f32.mrf.mxu0 }
 0x19c   :  { %v1748_v48 = vpop.f32.mrf.mxu1 }
 0x19d   :  { %5590 = vst [vmem:[#allocation55_spill] sm:$0xff] %v4868_v63  ;;  %v4873_v2 = vadd.f32 %v1748_v48, %v4532_v15 }
 0x19e   :  { %v1750_v35 = vpop.f32.mrf.mxu1 }
 0x19f   :  { %5591 = vst [vmem:[#allocation56_spill] sm:$0xff] %v4873_v2  ;;  %v4876_v6 = vadd.f32 %v1750_v35, %v4540_v19  ;;  %v4894_v35 = vpop.f32.mrf.mxu0 }
 0x1a0   :  { %v1752_v55 = vpop.f32.mrf.mxu1 }
 0x1a1   :  { %5592 = vst [vmem:[#allocation57_spill] sm:$0xff] %v4876_v6  ;;  %v4881_v9 = vadd.f32 %v1752_v55, %v4545_v22 }
 0x1a2   :  { %v1756_v42 = vpop.f32.mrf.mxu1 }
 0x1a3   :  { %5593 = vst [vmem:[#allocation58_spill] sm:$0xff] %v4881_v9  ;;  %v4884_v12 = vadd.f32 %v1756_v42, %v4556_v28  ;;  %v4902_v42 = vpop.f32.mrf.mxu0 }
 0x1a4   :  { %v1758_v63 = vpop.f32.mrf.mxu1 }
 0x1a5   :  { %5594 = vst [vmem:[#allocation59_spill] sm:$0xff] %v4884_v12  ;;  %v4889_v15 = vadd.f32 %v1758_v63, %v4562_v33 }
 0x1a6   :  { %v1760_v48 = vpop.f32.mrf.mxu1 }
 0x1a7   :  { %5595 = vst [vmem:[#allocation60_spill] sm:$0xff] %v4889_v15  ;;  %v4892_v19 = vadd.f32 %v1760_v48, %v4570_v43  ;;  %v4910_v48 = vpop.f32.mrf.mxu0 }
 0x1a8   :  { %v1762_v6 = vpop.f32.mrf.mxu1 }
 0x1a9   :  { %5596 = vst [vmem:[#allocation61_spill] sm:$0xff] %v4892_v19  ;;  %v4897_v22 = vadd.f32 %v1762_v6, %v4575_v52 }
 0x1aa   :  { %v1766_v55 = vpop.f32.mrf.mxu1 }
 0x1ab   :  { %5597 = vst [vmem:[#allocation62_spill] sm:$0xff] %v4897_v22  ;;  %v4900_v28 = vadd.f32 %v1766_v55, %v4580_v59  ;;  %v4918_v55 = vpop.f32.mrf.mxu0  ;;  %v5616_v22 = vld [vmem:[#allocation22_spill] sm:$0xff] }
 0x1ac   :  { %v1768_v12 = vpop.f32.mrf.mxu1 }
 0x1ad   :  { %5598 = vst [vmem:[#allocation63_spill] sm:$0xff] %v4900_v28  ;;  %v4905_v33 = vadd.f32 %v1768_v12, %v4586_v0 }
 0x1ae   :  { %v1770_v63 = vpop.f32.mrf.mxu1 }
 0x1af   :  { %5599 = vst [vmem:[#allocation64_spill] sm:$0xff] %v4905_v33  ;;  %v4908_v43 = vadd.f32 %v1770_v63, %v4594_v10  ;;  %v4926_v63 = vpop.f32.mrf.mxu0 }
 0x1b0   :  { %v1772_v19 = vpop.f32.mrf.mxu1 }
 0x1b1   :  { %5600 = vst [vmem:[#allocation65_spill] sm:$0xff] %v4908_v43  ;;  %v4913_v52 = vadd.f32 %v1772_v19, %v4599_v18 }
 0x1b2   :  { %v1776_v6 = vpop.f32.mrf.mxu1 }
 0x1b3   :  { %5601 = vst [vmem:[#allocation66_spill] sm:$0xff] %v4913_v52  ;;  %v4916_v59 = vadd.f32 %v1776_v6, %v4610_v31  ;;  %v4934_v6 = vpop.f32.mrf.mxu0  ;;  %v5614_v52 = vld [vmem:[#allocation19_spill] sm:$0xff] }
 0x1b4   :  { %v1778_v28 = vpop.f32.mrf.mxu1 }
 0x1b5   :  { %5602 = vst [vmem:[#allocation67_spill] sm:$0xff] %v4916_v59  ;;  %v4921_v0 = vadd.f32 %v1778_v28, %v4616_v46  ;;  %v1448_v46 = vadd.f32 %v4456_v40, %v4435_v29  ;;  %v5610_v40 = vld [vmem:[#allocation16_spill] sm:$0xff] }
 0x1b6   :  { %v1780_v12 = vpop.f32.mrf.mxu1 }
 0x1b7   :  { %5603 = vst [vmem:[#allocation68_spill] sm:$0xff] %v4921_v0  ;;  %v4924_v10 = vadd.f32 %v1780_v12, %v4624_v7  ;;  %v1450_v12 = vadd.f32 %v4464_v44, %v4437_v30 }
 0x1b8   :  { %v1782_v43 = vpop.f32.mrf.mxu1 }
 0x1b9   :  { %5604 = vst [vmem:[#allocation69_spill] sm:$0xff] %v4924_v10  ;;  %v4929_v18 = vadd.f32 %v1782_v43, %v4629_v20  ;;  %v4946_v43 = vpop.f32.mrf.mxu0  ;;  %v5613_v10 = vld [vmem:[#allocation17_spill] sm:$0xff] }
 0x1ba   :  { %v1786_v19 = vpop.f32.mrf.mxu1 }
 0x1bb   :  { %5605 = vst [vmem:[#allocation70_spill] sm:$0xff] %v4929_v18  ;;  %v4932_v31 = vadd.f32 %v1786_v19, %v4634_v24  ;;  %v1641_v19 = vadd.f32 %v4674_v57, %v1448_v46 }
 0x1bc   :  { %v1788_v59 = vpop.f32.mrf.mxu1 }
 0x1bd   :  { %5606 = vst [vmem:[#allocation71_spill] sm:$0xff] %v4932_v31  ;;  %v4939_v28 = vadd.f32 %v1788_v59, %v4640_v54  ;;  %v1830_v54 = vadd.f32 %v5610_v40, %v4667_v4  ;;  %v1643_v59 = vadd.f32 %v4681_v8, %v1450_v12  ;;  %v1834_v57 = vadd.f32 %v5614_v52, %v1641_v19 }
 0x1be   :  { %v1790_v7 = vpop.f32.mrf.mxu1 }
 0x1bf   :  { %5607 = vst [vmem:[#allocation72_spill] sm:$0xff] %v4939_v28  ;;  %v4944_v20 = vadd.f32 %v1790_v7, %v4650_v23  ;;  %v4955_v28 = vpop.f32.mrf.mxu0  ;;  %v5611_v23 = vld [vmem:[#allocation2_spill] sm:$0xff]  ;;  %v1836_v4 = vadd.f32 %v4690_v34, %v1643_v59  ;;  %v5619_v34 = vld [vmem:[#allocation4_spill] sm:$0xff] }
 0x1c0   :  { %v1792_v24 = vpop.f32.mrf.mxu1  ;;  %v1458_v7 = vadd.f32 %v5611_v23, %v4435_v29 }
 0x1c1   :  { %5608 = vst [vmem:[#allocation73_spill] sm:$0xff] %v4944_v20  ;;  %v4950_v31 = vadd.f32 %v1792_v24, %v4657_v17  ;;  %v5612_v20 = vld [vmem:[#allocation18_spill] sm:$0xff]  ;;  %v5615_v24 = vld [vmem:[#allocation3_spill] sm:$0xff]  ;;  %v4965_v12 = vpop.f32.mrf.mxu0 }
 0x1c2   :  { %v2022_v18 = vpop.f32.mrf.mxu1  ;;  %v1832_v0 = vadd.f32 %v5613_v10, %v5612_v20  ;;  %v1651_v15 = vadd.f32 %v5616_v22, %v1458_v7  ;;  %v5617_v10 = vld [vmem:[#allocation20_spill] sm:$0xff]  ;;  %v5618_v20 = vld [vmem:[#allocation23_spill] sm:$0xff] }
 0x1c3   :  { %5609 = vst [vmem:[#allocation74_spill] sm:$0xff] %v4950_v31  ;;  %v2023_v46 = vadd.f32 %v2022_v18, %v1830_v54  ;;  %v1460_v31 = vadd.f32 %v5615_v24, %v4437_v30  ;;  %v1840_v52 = vadd.f32 %v4701_v13, %v5617_v10  ;;  %v4973_v59 = vpop.f32.mrf.mxu0 }
 0x1c4   :  { %v2024_v44 = vpop.f32.mrf.mxu1 }
 0x1c5   :  { %v2025_v40 = vadd.f32 %v2024_v44, %v1832_v0  ;;  %v2181_v23 = vmax.f32 %v2023_v46, 0.0  ;;  %v1653_v19 = vadd.f32 %v5618_v20, %v1460_v31  ;;  %v1468_v0 = vadd.f32 %v5619_v34, %v4435_v29 }
 0x1c6   :  { %v2026_v17 = vpop.f32.mrf.mxu1 }
 0x1c7   :  { %v2027_v8 = vadd.f32 %v2026_v17, %v1834_v57  ;;  %v2182_v54 = vmax.f32 %v2025_v40, 0.0  ;;  %v5620_v57 = vld [vmem:[#allocation21_spill] sm:$0xff]  ;;  %v4981_v40 = vpop.f32.mrf.mxu0 }
 0x1c8   :  { %v2028_v33 = vpop.f32.mrf.mxu1  ;;  %v1842_v22 = vadd.f32 %v4710_v37, %v5620_v57  ;;  %v5621_v17 = vld [vmem:[#allocation5_spill] sm:$0xff] }
 0x1c9   :  { %v2183_v9 = vmax.f32 %v2027_v8, 0.0  ;;  %v2029_v2 = vadd.f32 %v2028_v33, %v1836_v4  ;;  %v1844_v33 = vadd.f32 %v4721_v53, %v1651_v15  ;;  %v1470_v31 = vadd.f32 %v5621_v17, %v4437_v30  ;;  %v5627_v17 = vld [vmem:[#allocation7_spill] sm:$0xff] }
 0x1ca   :  { %v2032_v18 = vpop.f32.mrf.mxu1 }
 0x1cb   :  { %v2245_v24 = vpack.c.bf16 %v2183_v9, %v2181_v23  ;;  %v2184_v58 = vmax.f32 %v2029_v2, 0.0  ;;  %v2033_v46 = vadd.f32 %v2032_v18, %v1840_v52  ;;  %v1846_v9 = vadd.f32 %v4730_v39, %v1653_v19  ;;  %v5622_v23 = vld [vmem:[#allocation26_spill] sm:$0xff]  ;;  %v5624_v18 = vld [vmem:[#allocation27_spill] sm:$0xff] }
 0x1cc   :  { %v2034_v44 = vpop.f32.mrf.mxu1  ;;  %v1661_v10 = vadd.f32 %v5622_v23, %v1468_v0 }
 0x1cd   :  { %v2246_v7 = vpack.c.bf16 %v2184_v58, %v2182_v54  ;;  %v2035_v2 = vadd.f32 %v2034_v44, %v1842_v22  ;;  %v2185_v37 = vmax.f32 %v2033_v46, 0.0  ;;  %v5623_v58 = vld [vmem:[#allocation24_spill] sm:$0xff]  ;;  %v1663_v54 = vadd.f32 %v5624_v18, %v1470_v31  ;;  %v5625_v44 = vld [vmem:[#allocation6_spill] sm:$0xff]  ;;  %v4989_v22 = vpop.f32.mrf.mxu0 }
 0x1ce   :  { %v2036_v13 = vpop.f32.mrf.mxu1  ;;  %v1850_v15 = vadd.f32 %v4741_v47, %v5623_v58  ;;  %v1478_v57 = vadd.f32 %v5625_v44, %v4435_v29  ;;  %v1480_v31 = vadd.f32 %v5627_v17, %v4437_v30 }
 0x1cf   :  { %v2037_v4 = vadd.f32 %v2036_v13, %v1844_v33  ;;  %2444 = vmatprep.mubr.bf16.mxu0 %v2246_v7  ;;  %v2186_v34 = vmax.f32 %v2035_v2, 0.0  ;;  %v5626_v33 = vld [vmem:[#allocation25_spill] sm:$0xff]  ;;  %v1854_v7 = vadd.f32 %v4761_v62, %v1661_v10  ;;  %v5629_v10 = vld [vmem:[#allocation28_spill] sm:$0xff] }
 0x1d0   :  { %v2038_v8 = vpop.f32.mrf.mxu1  ;;  %2445 = vmatmul.mubr.bf16.vlgmr.msra.gmra.mxu0 %v2245_v24  ;;  %v1852_v0 = vadd.f32 %v4750_v50, %v5626_v33  ;;  %v1860_v58 = vadd.f32 %v4781_v11, %v5629_v10  ;;  %v5632_v33 = vld [vmem:[#allocation29_spill] sm:$0xff] }
 0x1d1   :  { %v2187_v20 = vmax.f32 %v2037_v4, 0.0  ;;  %v2039_v53 = vadd.f32 %v2038_v8, %v1846_v9  ;;  %v1856_v9 = vadd.f32 %v4770_v1, %v1663_v54  ;;  %v4997_v8 = vpop.f32.mrf.mxu0 }
 0x1d2   :  { %v2042_v52 = vpop.f32.mrf.mxu1 }
 0x1d3   :  { %v2247_v39 = vpack.c.bf16 %v2187_v20, %v2185_v37  ;;  %v2188_v19 = vmax.f32 %v2039_v53, 0.0  ;;  %v2043_v13 = vadd.f32 %v2042_v52, %v1850_v15  ;;  %v5628_v37 = vld [vmem:[#allocation30_spill] sm:$0xff]  ;;  %v5630_v52 = vld [vmem:[#allocation31_spill] sm:$0xff] }
 0x1d4   :  { %v2044_v24 = vpop.f32.mrf.mxu1  ;;  %v1671_v20 = vadd.f32 %v5628_v37, %v1478_v57  ;;  %v1673_v18 = vadd.f32 %v5630_v52, %v1480_v31  ;;  %v1862_v57 = vadd.f32 %v4790_v14, %v5632_v33  ;;  %v5635_v37 = vld [vmem:[#allocation34_spill] sm:$0xff]  ;;  %v5639_v33 = vld [vmem:[#allocation33_spill] sm:$0xff] }
 0x1d5   :  { %v2248_v46 = vpack.c.bf16 %v2188_v19, %v2186_v34  ;;  %v2045_v2 = vadd.f32 %v2044_v24, %v1852_v0  ;;  %v2189_v50 = vmax.f32 %v2043_v13, 0.0  ;;  %v5631_v19 = vld [vmem:[#allocation8_spill] sm:$0xff]  ;;  %v5005_v24 = vpop.f32.mrf.mxu0  ;;  %v5633_v0 = vld [vmem:[#allocation43_spill] sm:$0xff] }
 0x1d6   :  { %v2046_v47 = vpop.f32.mrf.mxu1  ;;  %v1488_v44 = vadd.f32 %v5631_v19, %v4435_v29  ;;  %v1866_v31 = vadd.f32 %v4809_v32, %v1673_v18 }
 0x1d7   :  { %v2047_v4 = vadd.f32 %v2046_v47, %v1854_v7  ;;  %2452 = vmatprep.mubr.bf16.mxu0 %v2248_v46  ;;  %v2190_v34 = vmax.f32 %v2045_v2, 0.0  ;;  %v1864_v7 = vadd.f32 %v5633_v0, %v1671_v20  ;;  %v5634_v47 = vld [vmem:[#allocation9_spill] sm:$0xff] }
 0x1d8   :  { %v2048_v23 = vpop.f32.mrf.mxu1  ;;  %2453 = vmatmul.mubr.bf16.gmra.mxu0 %v2247_v39  ;;  %v1490_v17 = vadd.f32 %v5634_v47, %v4437_v30 }
 0x1d9   :  { %v2191_v53 = vmax.f32 %v2047_v4, 0.0  ;;  %v2049_v62 = vadd.f32 %v2048_v23, %v1856_v9  ;;  %v5013_v4 = vpop.f32.mrf.mxu0 }
 0x1da   :  { %v2052_v15 = vpop.f32.mrf.mxu1 }
 0x1db   :  { %v2249_v1 = vpack.c.bf16 %v2191_v53, %v2189_v50  ;;  %v2192_v54 = vmax.f32 %v2049_v62, 0.0  ;;  %v2053_v13 = vadd.f32 %v2052_v15, %v1860_v58  ;;  %v1681_v50 = vadd.f32 %v5635_v37, %v1488_v44  ;;  %v5636_v62 = vld [vmem:[#allocation32_spill] sm:$0xff]  ;;  %v5637_v15 = vld [vmem:[#allocation35_spill] sm:$0xff] }
 0x1dc   :  { %v2054_v39 = vpop.f32.mrf.mxu1  ;;  %v1870_v10 = vadd.f32 %v4815_v49, %v5636_v62  ;;  %v1683_v52 = vadd.f32 %v5637_v15, %v1490_v17  ;;  %v1872_v44 = vadd.f32 %v4822_v5, %v5639_v33  ;;  %v5644_v15 = vld [vmem:[#allocation12_spill] sm:$0xff] }
 0x1dd   :  { %v2250_v46 = vpack.c.bf16 %v2192_v54, %v2190_v34  ;;  %v2055_v9 = vadd.f32 %v2054_v39, %v1862_v57  ;;  %v2193_v14 = vmax.f32 %v2053_v13, 0.0  ;;  %v5638_v54 = vld [vmem:[#allocation10_spill] sm:$0xff]  ;;  %v5021_v39 = vpop.f32.mrf.mxu0  ;;  %v1874_v57 = vadd.f32 %v4830_v3, %v1681_v50  ;;  %v5642_v50 = vld [vmem:[#allocation36_spill] sm:$0xff] }
 0x1de   :  { %v2056_v11 = vpop.f32.mrf.mxu1  ;;  %v1498_v19 = vadd.f32 %v5638_v54, %v4435_v29 }
 0x1df   :  { %v2057_v2 = vadd.f32 %v2056_v11, %v1864_v7  ;;  %2460 = vmatprep.mubr.bf16.mxu0 %v2250_v46  ;;  %v2194_v34 = vmax.f32 %v2055_v9, 0.0  ;;  %v5640_v46 = vld [vmem:[#allocation11_spill] sm:$0xff]  ;;  %v1876_v11 = vadd.f32 %v4838_v27, %v1683_v52  ;;  %v1508_v52 = vadd.f32 %v5644_v15, %v4435_v29 }
 0x1e0   :  { %v2058_v23 = vpop.f32.mrf.mxu1  ;;  %2461 = vmatmul.mubr.bf16.gmra.mxu0 %v2249_v1  ;;  %v1500_v13 = vadd.f32 %v5640_v46, %v4437_v30 }
 0x1e1   :  { %v2195_v53 = vmax.f32 %v2057_v2, 0.0  ;;  %v2059_v20 = vadd.f32 %v2058_v23, %v1866_v31  ;;  %v5029_v31 = vpop.f32.mrf.mxu0  ;;  %v5641_v2 = vld [vmem:[#allocation38_spill] sm:$0xff] }
 0x1e2   :  { %v2062_v58 = vpop.f32.mrf.mxu1  ;;  %v1691_v23 = vadd.f32 %v5641_v2, %v1498_v19 }
 0x1e3   :  { %v2251_v32 = vpack.c.bf16 %v2195_v53, %v2193_v14  ;;  %v2196_v18 = vmax.f32 %v2059_v20, 0.0  ;;  %v2063_v7 = vadd.f32 %v2062_v58, %v1870_v10  ;;  %v1880_v14 = vadd.f32 %v4846_v61, %v5642_v50  ;;  %v5643_v20 = vld [vmem:[#allocation39_spill] sm:$0xff] }
 0x1e4   :  { %v2064_v1 = vpop.f32.mrf.mxu1  ;;  %v1693_v62 = vadd.f32 %v5643_v20, %v1500_v13  ;;  %v1884_v19 = vadd.f32 %v4862_v26, %v1691_v23 }
 0x1e5   :  { %v2252_v0 = vpack.c.bf16 %v2196_v18, %v2194_v34  ;;  %v2065_v47 = vadd.f32 %v2064_v1, %v1872_v44  ;;  %v2197_v5 = vmax.f32 %v2063_v7, 0.0  ;;  %v5037_v34 = vpop.f32.mrf.mxu0  ;;  %v5645_v18 = vld [vmem:[#allocation37_spill] sm:$0xff] }
 0x1e6   :  { %v2066_v49 = vpop.f32.mrf.mxu1  ;;  %v1882_v54 = vadd.f32 %v4854_v36, %v5645_v18  ;;  %v5646_v44 = vld [vmem:[#allocation13_spill] sm:$0xff] }
 0x1e7   :  { %v2067_v17 = vadd.f32 %v2066_v49, %v1874_v57  ;;  %2468 = vmatprep.mubr.bf16.mxu0 %v2252_v0  ;;  %v2198_v10 = vmax.f32 %v2065_v47, 0.0  ;;  %v1510_v57 = vadd.f32 %v5646_v44, %v4437_v30  ;;  %v1886_v0 = vadd.f32 %v4870_v25, %v1693_v62  ;;  %v5045_v46 = vpop.f32.mrf.mxu0 }
 0x1e8   :  { %v2068_v9 = vpop.f32.mrf.mxu1  ;;  %2469 = vmatmul.mubr.bf16.gmra.mxu0 %v2251_v32 }
 0x1e9   :  { %v2199_v37 = vmax.f32 %v2067_v17, 0.0  ;;  %v2069_v3 = vadd.f32 %v2068_v9, %v1876_v11  ;;  %v5647_v11 = vld [vmem:[#allocation42_spill] sm:$0xff]  ;;  %v5648_v9 = vld [vmem:[#allocation40_spill] sm:$0xff]  ;;  %v5053_v20 = vpop.f32.mrf.mxu0 }
 0x1ea   :  { %v2072_v53 = vpop.f32.mrf.mxu1  ;;  %v1701_v47 = vadd.f32 %v5647_v11, %v1508_v52  ;;  %v1890_v2 = vadd.f32 %v4878_v56, %v5648_v9 }
 0x1eb   :  { %v2253_v27 = vpack.c.bf16 %v2199_v37, %v2197_v5  ;;  %v2200_v58 = vmax.f32 %v2069_v3, 0.0  ;;  %v2073_v33 = vadd.f32 %v2072_v53, %v1880_v14  ;;  %v5649_v5 = vld [vmem:[#allocation44_spill] sm:$0xff]  ;;  %v5650_v14 = vld [vmem:[#allocation14_spill] sm:$0xff] }
 0x1ec   :  { %v2074_v32 = vpop.f32.mrf.mxu1  ;;  %v1703_v37 = vadd.f32 %v5649_v5, %v1510_v57  ;;  %v1518_v53 = vadd.f32 %v5650_v14, %v4435_v29  ;;  %v5061_v29 = vpop.f32.mrf.mxu0  ;;  %v5653_v57 = vld [vmem:[#allocation45_spill] sm:$0xff] }
 0x1ed   :  { %v2254_v1 = vpack.c.bf16 %v2200_v58, %v2198_v10  ;;  %v2075_v7 = vadd.f32 %v2074_v32, %v1882_v54  ;;  %v2201_v36 = vmax.f32 %v2073_v33, 0.0  ;;  %v5651_v10 = vld [vmem:[#allocation41_spill] sm:$0xff]  ;;  %v1894_v58 = vadd.f32 %v4894_v35, %v1701_v47  ;;  %v5652_v32 = vld [vmem:[#allocation15_spill] sm:$0xff] }
 0x1ee   :  { %v2076_v61 = vpop.f32.mrf.mxu1  ;;  %v1520_v18 = vadd.f32 %v5652_v32, %v4437_v30  ;;  %v1896_v54 = vadd.f32 %v4902_v42, %v1703_v37  ;;  %v5067_v47 = vpop.f32.mrf.mxu0 }
 0x1ef   :  { %v2077_v49 = vadd.f32 %v2076_v61, %v1884_v19  ;;  %2476 = vmatprep.mubr.bf16.mxu0 %v2254_v1  ;;  %v2202_v3 = vmax.f32 %v2075_v7, 0.0  ;;  %v1711_v61 = vadd.f32 %v4813_v21, %v1518_v53 }
 0x1f0   :  { %v2078_v13 = vpop.f32.mrf.mxu1  ;;  %2477 = vmatmul.mubr.bf16.gmra.mxu0 %v2253_v27  ;;  %v1892_v27 = vadd.f32 %v4886_v60, %v5651_v10  ;;  %v5656_v10 = vld [vmem:[#allocation48_spill] sm:$0xff] }
 0x1f1   :  { %v2203_v17 = vmax.f32 %v2077_v49, 0.0  ;;  %v2079_v26 = vadd.f32 %v2078_v13, %v1886_v0  ;;  %v1900_v0 = vadd.f32 %v4910_v48, %v5653_v57  ;;  %v5654_v49 = vld [vmem:[#allocation47_spill] sm:$0xff]  ;;  %v1904_v21 = vadd.f32 %v4926_v63, %v1711_v61 }
 0x1f2   :  { %v2082_v23 = vpop.f32.mrf.mxu1  ;;  %v1713_v30 = vadd.f32 %v5654_v49, %v1520_v18 }
 0x1f3   :  { %v2255_v25 = vpack.c.bf16 %v2203_v17, %v2201_v36  ;;  %v2204_v50 = vmax.f32 %v2079_v26, 0.0  ;;  %v2083_v52 = vadd.f32 %v2082_v23, %v1890_v2  ;;  %v5655_v17 = vld [vmem:[#allocation46_spill] sm:$0xff] }
 0x1f4   :  { %v2084_v62 = vpop.f32.mrf.mxu1  ;;  %v1902_v26 = vadd.f32 %v4918_v55, %v5655_v17  ;;  %v1906_v5 = vadd.f32 %v4934_v6, %v1713_v30  ;;  %v1910_v55 = vadd.f32 %v4946_v43, %v5656_v10 }
 0x1f5   :  { %v2256_v15 = vpack.c.bf16 %v2204_v50, %v2202_v3  ;;  %v2085_v19 = vadd.f32 %v2084_v62, %v1892_v27  ;;  %v2205_v60 = vmax.f32 %v2083_v52, 0.0  ;;  %v5073_v3 = vpop.f32.mrf.mxu0  ;;  %v1912_v52 = vadd.f32 %v4955_v28, %v4825_v41  ;;  %v5658_v28 = vld [vmem:[#allocation50_spill] sm:$0xff] }
 0x1f6   :  { %v2086_v56 = vpop.f32.mrf.mxu1 }
 0x1f7   :  { %v2087_v1 = vadd.f32 %v2086_v56, %v1894_v58  ;;  %2484 = vmatprep.mubr.bf16.mxu0 %v2256_v15  ;;  %v2206_v13 = vmax.f32 %v2085_v19, 0.0  ;;  %v5077_v15 = vpop.f32.mrf.mxu0  ;;  %v5657_v56 = vld [vmem:[#allocation49_spill] sm:$0xff] }
 0x1f8   :  { %v2088_v33 = vpop.f32.mrf.mxu1  ;;  %2485 = vmatmul.mubr.bf16.gmra.mxu0 %v2255_v25  ;;  %v1914_v32 = vadd.f32 %v4965_v12, %v5657_v56  ;;  %v1920_v12 = vadd.f32 %v4981_v40, %v5658_v28 }
 0x1f9   :  { %v2207_v44 = vmax.f32 %v2087_v1, 0.0  ;;  %v2089_v35 = vadd.f32 %v2088_v33, %v1896_v54  ;;  %v1916_v1 = vadd.f32 %v4973_v59, %v4833_v16  ;;  %v5085_v61 = vpop.f32.mrf.mxu0  ;;  %v1922_v59 = vadd.f32 %v4989_v22, %v4841_v38  ;;  %v5660_v22 = vld [vmem:[#allocation52_spill] sm:$0xff] }
 0x1fa   :  { %v2092_v7 = vpop.f32.mrf.mxu1 }
 0x1fb   :  { %v2257_v42 = vpack.c.bf16 %v2207_v44, %v2205_v60  ;;  %v2208_v11 = vmax.f32 %v2089_v35, 0.0  ;;  %v2093_v2 = vadd.f32 %v2092_v7, %v1900_v0  ;;  %v5089_v30 = vpop.f32.mrf.mxu0 }
 0x1fc   :  { %v2094_v36 = vpop.f32.mrf.mxu1 }
 0x1fd   :  { %v2258_v9 = vpack.c.bf16 %v2208_v11, %v2206_v13  ;;  %v2095_v48 = vadd.f32 %v2094_v36, %v1902_v26  ;;  %v2209_v50 = vmax.f32 %v2093_v2, 0.0  ;;  %v5659_v13 = vld [vmem:[#allocation51_spill] sm:$0xff]  ;;  %v1926_v26 = vadd.f32 %v5005_v24, %v4849_v45 }
 0x1fe   :  { %v2096_v23 = vpop.f32.mrf.mxu1  ;;  %v1932_v24 = vadd.f32 %v5021_v39, %v4857_v51  ;;  %v5663_v51 = vld [vmem:[#allocation55_spill] sm:$0xff] }
 0x1ff   :  { %v2097_v37 = vadd.f32 %v2096_v23, %v1904_v21  ;;  %2492 = vmatprep.mubr.bf16.mxu0 %v2258_v9  ;;  %v2210_v63 = vmax.f32 %v2095_v48, 0.0  ;;  %v5097_v9 = vpop.f32.mrf.mxu0  ;;  %v1940_v39 = vadd.f32 %v5045_v46, %v5663_v51 }
 0x200   :  { %v2098_v25 = vpop.f32.mrf.mxu1  ;;  %2493 = vmatmul.mubr.bf16.gmra.mxu0 %v2257_v42  ;;  %v1924_v42 = vadd.f32 %v4997_v8, %v5659_v13  ;;  %v1930_v8 = vadd.f32 %v5013_v4, %v5660_v22 }
 0x201   :  { %v2211_v14 = vmax.f32 %v2097_v37, 0.0  ;;  %v2099_v53 = vadd.f32 %v2098_v25, %v1906_v5 }
 0x202   :  { %v2102_v62 = vpop.f32.mrf.mxu1 }
 0x203   :  { %v2259_v27 = vpack.c.bf16 %v2211_v14, %v2209_v50  ;;  %v2212_v58 = vmax.f32 %v2099_v53, 0.0  ;;  %v2103_v54 = vadd.f32 %v2102_v62, %v1910_v55  ;;  %v5101_v14 = vpop.f32.mrf.mxu0  ;;  %v5661_v53 = vld [vmem:[#allocation53_spill] sm:$0xff] }
 0x204   :  { %v2104_v6 = vpop.f32.mrf.mxu1  ;;  %v1934_v62 = vadd.f32 %v5029_v31, %v5661_v53 }
 0x205   :  { %v2260_v18 = vpack.c.bf16 %v2212_v58, %v2210_v63  ;;  %v2105_v33 = vadd.f32 %v2104_v6, %v1912_v52  ;;  %v2213_v44 = vmax.f32 %v2103_v54, 0.0  ;;  %v1963_v52 = vpop.f32.mrf.mxu0 }
 0x206   :  { %v2106_v19 = vpop.f32.mrf.mxu1 }
 0x207   :  { %v2107_v43 = vadd.f32 %v2106_v19, %v1914_v32  ;;  %2500 = vmatprep.mubr.bf16.mxu0 %v2260_v18  ;;  %v2214_v0 = vmax.f32 %v2105_v33, 0.0 }
 0x208   :  { %v2108_v60 = vpop.f32.mrf.mxu1  ;;  %2501 = vmatmul.mubr.bf16.gmra.mxu0 %v2259_v27  ;;  %v5662_v27 = vld [vmem:[#allocation54_spill] sm:$0xff] }
 0x209   :  { %v2215_v35 = vmax.f32 %v2107_v43, 0.0  ;;  %v2109_v57 = vadd.f32 %v2108_v60, %v1916_v1  ;;  %v1936_v58 = vadd.f32 %v5037_v34, %v5662_v27  ;;  %v1965_v43 = vpop.f32.mrf.mxu0 }
 0x20a   :  { %v2112_v41 = vpop.f32.mrf.mxu1 }
 0x20b   :  { %v2261_v7 = vpack.c.bf16 %v2215_v35, %v2213_v44  ;;  %v2216_v49 = vmax.f32 %v2109_v57, 0.0  ;;  %v2113_v36 = vadd.f32 %v2112_v41, %v1920_v12  ;;  %v5664_v44 = vld [vmem:[#allocation56_spill] sm:$0xff]  ;;  %v5665_v35 = vld [vmem:[#allocation57_spill] sm:$0xff]  ;;  %v1969_v46 = vpop.f32.mrf.mxu0 }
 0x20c   :  { %v2114_v16 = vpop.f32.mrf.mxu1  ;;  %v1942_v34 = vadd.f32 %v5053_v20, %v5664_v44  ;;  %v1944_v57 = vadd.f32 %v5061_v29, %v5665_v35  ;;  %v5667_v20 = vld [vmem:[#allocation59_spill] sm:$0xff] }
 0x20d   :  { %v2262_v11 = vpack.c.bf16 %v2216_v49, %v2214_v0  ;;  %v2115_v21 = vadd.f32 %v2114_v16, %v1922_v59  ;;  %v2217_v23 = vmax.f32 %v2113_v36, 0.0  ;;  %v5666_v0 = vld [vmem:[#allocation58_spill] sm:$0xff] }
 0x20e   :  { %v2116_v17 = vpop.f32.mrf.mxu1 }
 0x20f   :  { %v2117_v40 = vadd.f32 %v2116_v17, %v1924_v42  ;;  %2508 = vmatprep.mubr.bf16.mxu0 %v2262_v11  ;;  %v2218_v37 = vmax.f32 %v2115_v21, 0.0  ;;  %v1950_v17 = vadd.f32 %v5073_v3, %v5667_v20 }
 0x210   :  { %v2118_v2 = vpop.f32.mrf.mxu1  ;;  %2509 = vmatmul.mubr.bf16.gmra.mxu0 %v2261_v7  ;;  %v1946_v7 = vadd.f32 %v5067_v47, %v5666_v0 }
 0x211   :  { %v2219_v5 = vmax.f32 %v2117_v40, 0.0  ;;  %v2119_v48 = vadd.f32 %v2118_v2, %v1926_v26  ;;  %v1971_v40 = vpop.f32.mrf.mxu0 }
 0x212   :  { %v2122_v38 = vpop.f32.mrf.mxu1 }
 0x213   :  { %v2263_v25 = vpack.c.bf16 %v2219_v5, %v2217_v23  ;;  %v2220_v50 = vmax.f32 %v2119_v48, 0.0  ;;  %v2123_v55 = vadd.f32 %v2122_v38, %v1930_v8  ;;  %v5668_v23 = vld [vmem:[#allocation60_spill] sm:$0xff]  ;;  %v5669_v5 = vld [vmem:[#allocation61_spill] sm:$0xff]  ;;  %v1973_v3 = vpop.f32.mrf.mxu0 }
 0x214   :  { %v2124_v45 = vpop.f32.mrf.mxu1  ;;  %v1952_v47 = vadd.f32 %v5077_v15, %v5668_v23  ;;  %v1954_v48 = vadd.f32 %v5085_v61, %v5669_v5  ;;  %v5671_v15 = vld [vmem:[#allocation63_spill] sm:$0xff] }
 0x215   :  { %v2264_v10 = vpack.c.bf16 %v2220_v50, %v2218_v37  ;;  %v2125_v6 = vadd.f32 %v2124_v45, %v1932_v24  ;;  %v2221_v32 = vmax.f32 %v2123_v55, 0.0  ;;  %v5670_v37 = vld [vmem:[#allocation62_spill] sm:$0xff]  ;;  %v5679_v5 = vld [vmem:[#allocation71_spill] sm:$0xff] }
 0x216   :  { %v2126_v63 = vpop.f32.mrf.mxu1 }
 0x217   :  { %v2127_v4 = vadd.f32 %v2126_v63, %v1934_v62  ;;  %2516 = vmatprep.mubr.bf16.mxu0 %v2264_v10  ;;  %v2222_v31 = vmax.f32 %v2125_v6, 0.0  ;;  %v1960_v63 = vadd.f32 %v5097_v9, %v5671_v15  ;;  %v1975_v6 = vpop.f32.mrf.mxu0 }
 0x218   :  { %v2128_v56 = vpop.f32.mrf.mxu1  ;;  %2517 = vmatmul.mubr.bf16.gmra.mxu0 %v2263_v25  ;;  %v1956_v25 = vadd.f32 %v5089_v30, %v5670_v37 }
 0x219   :  { %v2223_v18 = vmax.f32 %v2127_v4, 0.0  ;;  %v2129_v54 = vadd.f32 %v2128_v56, %v1936_v58  ;;  %v5672_v56 = vld [vmem:[#allocation64_spill] sm:$0xff] }
 0x21a   :  { %v2132_v19 = vpop.f32.mrf.mxu1  ;;  %v1962_v30 = vadd.f32 %v5101_v14, %v5672_v56 }
 0x21b   :  { %v2265_v1 = vpack.c.bf16 %v2223_v18, %v2221_v32  ;;  %v2224_v33 = vmax.f32 %v2129_v54, 0.0  ;;  %v2133_v28 = vadd.f32 %v2132_v19, %v1940_v39  ;;  %v5673_v32 = vld [vmem:[#allocation65_spill] sm:$0xff]  ;;  %v5674_v39 = vld [vmem:[#allocation66_spill] sm:$0xff] }
 0x21c   :  { %v2134_v60 = vpop.f32.mrf.mxu1  ;;  %v1964_v18 = vadd.f32 %v1963_v52, %v5673_v32 }
 0x21d   :  { %v2266_v41 = vpack.c.bf16 %v2224_v33, %v2222_v31  ;;  %v2135_v49 = vadd.f32 %v2134_v60, %v1942_v34  ;;  %v2225_v13 = vmax.f32 %v2133_v28, 0.0  ;;  %v1966_v31 = vadd.f32 %v1965_v43, %v5674_v39  ;;  %v1979_v60 = vpop.f32.mrf.mxu0  ;;  %v5677_v43 = vld [vmem:[#allocation69_spill] sm:$0xff] }
 0x21e   :  { %v2136_v12 = vpop.f32.mrf.mxu1 }
 0x21f   :  { %v2137_v16 = vadd.f32 %v2136_v12, %v1944_v57  ;;  %2524 = vmatprep.mubr.bf16.mxu0 %v2266_v41  ;;  %v2226_v29 = vmax.f32 %v2135_v49, 0.0  ;;  %v5675_v41 = vld [vmem:[#allocation67_spill] sm:$0xff]  ;;  %v1981_v0 = vpop.f32.mrf.mxu0  ;;  %v5676_v49 = vld [vmem:[#allocation68_spill] sm:$0xff] }
 0x220   :  { %v2138_v59 = vpop.f32.mrf.mxu1  ;;  %2525 = vmatmul.mubr.bf16.gmra.mxu0 %v2265_v1  ;;  %v1970_v28 = vadd.f32 %v1969_v46, %v5675_v41 }
 0x221   :  { %v2227_v42 = vmax.f32 %v2137_v16, 0.0  ;;  %v2139_v11 = vadd.f32 %v2138_v59, %v1946_v7  ;;  %v1972_v16 = vadd.f32 %v1971_v40, %v5676_v49  ;;  %v1974_v59 = vadd.f32 %v1973_v3, %v5677_v43 }
 0x222   :  { %v2142_v36 = vpop.f32.mrf.mxu1 }
 0x223   :  { %v2267_v26 = vpack.c.bf16 %v2227_v42, %v2225_v13  ;;  %v2228_v21 = vmax.f32 %v2139_v11, 0.0  ;;  %v2143_v22 = vadd.f32 %v2142_v36, %v1950_v17  ;;  %v5678_v36 = vld [vmem:[#allocation70_spill] sm:$0xff] }
 0x224   :  { %v2144_v2 = vpop.f32.mrf.mxu1  ;;  %v1976_v20 = vadd.f32 %v1975_v6, %v5678_v36 }
 0x225   :  { %v2268_v38 = vpack.c.bf16 %v2228_v21, %v2226_v29  ;;  %v2145_v50 = vadd.f32 %v2144_v2, %v1952_v47  ;;  %v2229_v53 = vmax.f32 %v2143_v22, 0.0 }
 0x226   :  { %v2146_v8 = vpop.f32.mrf.mxu1 }
 0x227   :  { %v2147_v45 = vadd.f32 %v2146_v8, %v1954_v48  ;;  %2532 = vmatprep.mubr.bf16.mxu0 %v2268_v38  ;;  %v2230_v61 = vmax.f32 %v2145_v50, 0.0  ;;  %v1980_v48 = vadd.f32 %v1979_v60, %v5679_v5 }
 0x228   :  { %v2148_v24 = vpop.f32.mrf.mxu1  ;;  %2533 = vmatmul.mubr.bf16.gmra.mxu0 %v2267_v26  ;;  %v1983_v26 = vpop.f32.mrf.mxu0 }
 0x229   :  { %v2231_v62 = vmax.f32 %v2147_v45, 0.0  ;;  %v2149_v10 = vadd.f32 %v2148_v24, %v1956_v25  ;;  %v5680_v25 = vld [vmem:[#allocation72_spill] sm:$0xff]  ;;  %v5681_v45 = vld [vmem:[#allocation73_spill] sm:$0xff] }
 0x22a   :  { %v2152_v55 = vpop.f32.mrf.mxu1  ;;  %v1985_v8 = vpop.f32.mrf.mxu0  ;;  %v1982_v50 = vadd.f32 %v1981_v0, %v5680_v25  ;;  %v1984_v3 = vadd.f32 %v1983_v26, %v5681_v45 }
 0x22b   :  { %v2269_v27 = vpack.c.bf16 %v2231_v62, %v2229_v53  ;;  %v2232_v58 = vmax.f32 %v2149_v10, 0.0  ;;  %v2153_v19 = vadd.f32 %v2152_v55, %v1960_v63  ;;  %v5682_v10 = vld [vmem:[#allocation74_spill] sm:$0xff] }
 0x22c   :  { %v2154_v4 = vpop.f32.mrf.mxu1  ;;  %v1986_v55 = vadd.f32 %v1985_v8, %v5682_v10 }
 0x22d   :  { %v2270_v54 = vpack.c.bf16 %v2232_v58, %v2230_v61  ;;  %v2155_v1 = vadd.f32 %v2154_v4, %v1962_v30  ;;  %v2233_v44 = vmax.f32 %v2153_v19, 0.0  ;;  %v5142_v19 = vld [vmem:[%s5532_s4] ss:$0 sm:$0xff] }
 0x22e   :  { %v2156_v51 = vpop.f32.mrf.mxu1 }
 0x22f   :  { %v2157_v33 = vadd.f32 %v2156_v51, %v1964_v18  ;;  %2540 = vmatprep.mubr.bf16.mxu0 %v2270_v54  ;;  %v2234_v14 = vmax.f32 %v2155_v1, 0.0 }
 0x230   :  { %v2158_v9 = vpop.f32.mrf.mxu1  ;;  %2541 = vmatmul.mubr.bf16.gmra.mxu0 %v2269_v27 }
 0x231   :  { %v2235_v34 = vmax.f32 %v2157_v33, 0.0  ;;  %v2159_v35 = vadd.f32 %v2158_v9, %v1966_v31 }
 0x232   :  { %v2162_v57 = vpop.f32.mrf.mxu1 }
 0x233   :  { %v2271_v12 = vpack.c.bf16 %v2235_v34, %v2233_v44  ;;  %v2236_v52 = vmax.f32 %v2159_v35, 0.0  ;;  %v2163_v42 = vadd.f32 %v2162_v57, %v1970_v28 }
 0x234   :  { %v2164_v7 = vpop.f32.mrf.mxu1 }
 0x235   :  { %v2272_v13 = vpack.c.bf16 %v2236_v52, %v2234_v14  ;;  %v2165_v17 = vadd.f32 %v2164_v7, %v1972_v16  ;;  %v2237_v46 = vmax.f32 %v2163_v42, 0.0 }
 0x236   :  { %v2166_v11 = vpop.f32.mrf.mxu1 }
 0x237   :  { %v2167_v29 = vadd.f32 %v2166_v11, %v1974_v59  ;;  %2548 = vmatprep.mubr.bf16.mxu0 %v2272_v13  ;;  %v2238_v40 = vmax.f32 %v2165_v17, 0.0 }
 0x238   :  { %v2168_v21 = vpop.f32.mrf.mxu1  ;;  %2549 = vmatmul.mubr.bf16.gmra.mxu0 %v2271_v12 }
 0x239   :  { %v2239_v2 = vmax.f32 %v2167_v29, 0.0  ;;  %v2169_v23 = vadd.f32 %v2168_v21, %v1976_v20 }
 0x23a   :  { %v2172_v47 = vpop.f32.mrf.mxu1 }
 0x23b   :  { %v2273_v38 = vpack.c.bf16 %v2239_v2, %v2237_v46  ;;  %v2240_v22 = vmax.f32 %v2169_v23, 0.0  ;;  %v2173_v53 = vadd.f32 %v2172_v47, %v1980_v48 }
 0x23c   :  { %v2174_v37 = vpop.f32.mrf.mxu1 }
 0x23d   :  { %v2274_v24 = vpack.c.bf16 %v2240_v22, %v2238_v40  ;;  %v2175_v15 = vadd.f32 %v2174_v37, %v1982_v50  ;;  %v2241_v27 = vmax.f32 %v2173_v53, 0.0 }
 0x23e   :  { %v2176_v62 = vpop.f32.mrf.mxu1 }
 0x23f   :  { %v2177_v63 = vadd.f32 %v2176_v62, %v1984_v3  ;;  %2556 = vmatprep.mubr.bf16.mxu0 %v2274_v24  ;;  %v2242_v4 = vmax.f32 %v2175_v15, 0.0 }
 0x240   :  { %v2178_v61 = vpop.f32.mrf.mxu1  ;;  %2557 = vmatmul.mubr.bf16.gmra.mxu0 %v2273_v38 }
 0x241   :  { %v2243_v58 = vmax.f32 %v2177_v63, 0.0  ;;  %v2179_v6 = vadd.f32 %v2178_v61, %v1986_v55 }
 0x243   :  { %v2275_v56 = vpack.c.bf16 %v2243_v58, %v2241_v27  ;;  %v2244_v30 = vmax.f32 %v2179_v6, 0.0 }
 0x245   :  { %v2276_v32 = vpack.c.bf16 %v2244_v30, %v2242_v4 }
 0x247   :  { %2564 = vmatprep.mubr.bf16.mxu0 %v2276_v32 }
 0x248   :  { %2565 = vmatmul.mubr.bf16.gmra.mxu0 %v2275_v56 }
 0x290   :  { %v3154_v18 = vpop.f32.mrf.mxu0 }
 0x292   :  { %v3155_v54 = vpop.f32.mrf.mxu0 }
 0x293   :  { %v3156_v51 = vadd.f32 %v3155_v54, %v3154_v18 }
 0x294   :  { %v3157_v39 = vpop.f32.mrf.mxu0 }
 0x295   :  { %v5145_v31 = vadd.f32 %v3156_v51, %v5142_v19 }
 0x296   :  { %v3158_v1 = vpop.f32.mrf.mxu0 }
 0x297   :  { %v3159_v33 = vadd.f32 %v3158_v1, %v3157_v39  ;;  %2573 = vmax.xlane.f32.xlu0 %v5145_v31 }
 0x298   :  { %v3160_v60 = vpop.f32.mrf.mxu0 }
 0x299   :  { %v5149_v9 = vadd.f32 %v3159_v33, %v5142_v19 }
 0x29a   :  { %v3161_v44 = vpop.f32.mrf.mxu0 }
 0x29b   :  { %v3162_v34 = vadd.f32 %v3161_v44, %v3160_v60  ;;  %2575 = vmax.xlane.f32.xlu0 %v5149_v9 }
 0x29c   :  { %v3163_v35 = vpop.f32.mrf.mxu0 }
 0x29d   :  { %v5153_v57 = vadd.f32 %v3162_v34, %v5142_v19 }
 0x29e   :  { %v3164_v41 = vpop.f32.mrf.mxu0 }
 0x29f   :  { %v3165_v28 = vadd.f32 %v3164_v41, %v3163_v35  ;;  %2577 = vmax.xlane.f32.xlu1 %v5153_v57 }
 0x2a0   :  { %v3166_v14 = vpop.f32.mrf.mxu0 }
 0x2a1   :  { %v5157_v12 = vadd.f32 %v3165_v28, %v5142_v19 }
 0x2a2   :  { %v3167_v52 = vpop.f32.mrf.mxu0 }
 0x2a3   :  { %v3168_v0 = vadd.f32 %v3167_v52, %v3166_v14  ;;  %2579 = vmax.xlane.f32.xlu1 %v5157_v12 }
 0x2a4   :  { %v3169_v7 = vpop.f32.mrf.mxu0 }
 0x2a5   :  { %v5161_v49 = vadd.f32 %v3168_v0, %v5142_v19 }
 0x2a6   :  { %v3170_v16 = vpop.f32.mrf.mxu0 }
 0x2a7   :  { %v3171_v43 = vadd.f32 %v3170_v16, %v3169_v7  ;;  %2581 = vmax.xlane.f32.xlu0 %v5161_v49 }
 0x2a8   :  { %v3172_v59 = vpop.f32.mrf.mxu0 }
 0x2a9   :  { %v5165_v13 = vadd.f32 %v3171_v43, %v5142_v19 }
 0x2aa   :  { %v3173_v42 = vpop.f32.mrf.mxu0 }
 0x2ab   :  { %v3174_v11 = vadd.f32 %v3173_v42, %v3172_v59  ;;  %2583 = vmax.xlane.f32.xlu1 %v5165_v13 }
 0x2ac   :  { %v3175_v36 = vpop.f32.mrf.mxu0 }
 0x2ad   :  { %v5169_v20 = vadd.f32 %v3174_v11, %v5142_v19 }
 0x2ae   :  { %v3176_v17 = vpop.f32.mrf.mxu0 }
 0x2af   :  { %v3177_v29 = vadd.f32 %v3176_v17, %v3175_v36  ;;  %2585 = vmax.xlane.f32.xlu0 %v5169_v20 }
 0x2b0   :  { %v3178_v26 = vpop.f32.mrf.mxu0 }
 0x2b1   :  { %v5173_v21 = vadd.f32 %v3177_v29, %v5142_v19 }
 0x2b2   :  { %v3179_v46 = vpop.f32.mrf.mxu0 }
 0x2b3   :  { %v3180_v2 = vadd.f32 %v3179_v46, %v3178_v26  ;;  %2587 = vmax.xlane.f32.xlu1 %v5173_v21 }
 0x2b4   :  { %v3181_v23 = vpop.f32.mrf.mxu0 }
 0x2b5   :  { %v5177_v47 = vadd.f32 %v3180_v2, %v5142_v19 }
 0x2b6   :  { %v3182_v5 = vpop.f32.mrf.mxu0 }
 0x2b7   :  { %v3183_v48 = vadd.f32 %v3182_v5, %v3181_v23  ;;  %2589 = vmax.xlane.f32.xlu0 %v5177_v47 }
 0x2b8   :  { %v3184_v40 = vpop.f32.mrf.mxu0 }
 0x2b9   :  { %v5181_v38 = vadd.f32 %v3183_v48, %v5142_v19 }
 0x2ba   :  { %v3185_v22 = vpop.f32.mrf.mxu0 }
 0x2bb   :  { %v3186_v8 = vadd.f32 %v3185_v22, %v3184_v40  ;;  %2591 = vmax.xlane.f32.xlu1 %v5181_v38 }
 0x2bc   :  { %v3187_v37 = vpop.f32.mrf.mxu0 }
 0x2bd   :  { %v5185_v25 = vadd.f32 %v3186_v8, %v5142_v19 }
 0x2be   :  { %v3188_v50 = vpop.f32.mrf.mxu0 }
 0x2bf   :  { %v3189_v45 = vadd.f32 %v3188_v50, %v3187_v37  ;;  %2593 = vmax.xlane.f32.xlu0 %v5185_v25 }
 0x2c0   :  { %v3190_v3 = vpop.f32.mrf.mxu0 }
 0x2c1   :  { %v5189_v24 = vadd.f32 %v3189_v45, %v5142_v19 }
 0x2c2   :  { %v3191_v53 = vpop.f32.mrf.mxu0 }
 0x2c3   :  { %v3192_v62 = vadd.f32 %v3191_v53, %v3190_v3  ;;  %2595 = vmax.xlane.f32.xlu1 %v5189_v24 }
 0x2c4   :  { %v3193_v10 = vpop.f32.mrf.mxu0 }
 0x2c5   :  { %v5193_v55 = vadd.f32 %v3192_v62, %v5142_v19 }
 0x2c6   :  { %v3194_v15 = vpop.f32.mrf.mxu0 }
 0x2c7   :  { %v3195_v63 = vadd.f32 %v3194_v15, %v3193_v10  ;;  %2597 = vmax.xlane.f32.xlu0 %v5193_v55 }
 0x2c8   :  { %v3196_v61 = vpop.f32.mrf.mxu0 }
 0x2c9   :  { %v5197_v27 = vadd.f32 %v3195_v63, %v5142_v19 }
 0x2ca   :  { %v3197_v58 = vpop.f32.mrf.mxu0 }
 0x2cb   :  { %v3198_v6 = vadd.f32 %v3197_v58, %v3196_v61  ;;  %2599 = vmax.xlane.f32.xlu1 %v5197_v27 }
 0x2cc   :  { %v3199_v4 = vpop.f32.mrf.mxu0 }
 0x2cd   :  { %v5201_v56 = vadd.f32 %v3198_v6, %v5142_v19 }
 0x2ce   :  { %v3200_v30 = vpop.f32.mrf.mxu0 }
 0x2cf   :  { %v3201_v32 = vadd.f32 %v3200_v30, %v3199_v4  ;;  %2601 = vmax.xlane.f32.xlu0 %v5201_v56 }
 0x2d0   :  { %v3202_v18 = vpop.f32.mrf.mxu0 }
 0x2d1   :  { %v5205_v54 = vadd.f32 %v3201_v32, %v5142_v19 }
 0x2d2   :  { %v3203_v51 = vpop.f32.mrf.mxu0 }
 0x2d3   :  { %v3204_v39 = vadd.f32 %v3203_v51, %v3202_v18  ;;  %2603 = vmax.xlane.f32.xlu1 %v5205_v54 }
 0x2d4   :  { %v3205_v1 = vpop.f32.mrf.mxu0 }
 0x2d5   :  { %v5209_v33 = vadd.f32 %v3204_v39, %v5142_v19 }
 0x2d6   :  { %v3206_v60 = vpop.f32.mrf.mxu0 }
 0x2d7   :  { %v3207_v44 = vadd.f32 %v3206_v60, %v3205_v1  ;;  %2605 = vmax.xlane.f32.xlu0 %v5209_v33 }
 0x2d8   :  { %v3208_v34 = vpop.f32.mrf.mxu0 }
 0x2d9   :  { %v5213_v35 = vadd.f32 %v3207_v44, %v5142_v19 }
 0x2da   :  { %v3209_v41 = vpop.f32.mrf.mxu0 }
 0x2db   :  { %v3210_v28 = vadd.f32 %v3209_v41, %v3208_v34  ;;  %2607 = vmax.xlane.f32.xlu1 %v5213_v35 }
 0x2dc   :  { %v3211_v14 = vpop.f32.mrf.mxu0 }
 0x2dd   :  { %v5217_v52 = vadd.f32 %v3210_v28, %v5142_v19 }
 0x2de   :  { %v3212_v0 = vpop.f32.mrf.mxu0 }
 0x2df   :  { %v3213_v7 = vadd.f32 %v3212_v0, %v3211_v14  ;;  %2609 = vmax.xlane.f32.xlu0 %v5217_v52 }
 0x2e0   :  { %v3214_v16 = vpop.f32.mrf.mxu0 }
 0x2e1   :  { %v5221_v43 = vadd.f32 %v3213_v7, %v5142_v19 }
 0x2e2   :  { %v3215_v59 = vpop.f32.mrf.mxu0 }
 0x2e3   :  { %v3216_v42 = vadd.f32 %v3215_v59, %v3214_v16  ;;  %2611 = vmax.xlane.f32.xlu1 %v5221_v43 }
 0x2e4   :  { %v3217_v11 = vpop.f32.mrf.mxu0 }
 0x2e5   :  { %v5225_v36 = vadd.f32 %v3216_v42, %v5142_v19 }
 0x2e6   :  { %v3218_v17 = vpop.f32.mrf.mxu0 }
 0x2e7   :  { %v3219_v29 = vadd.f32 %v3218_v17, %v3217_v11  ;;  %2613 = vmax.xlane.f32.xlu0 %v5225_v36 }
 0x2e8   :  { %v3220_v26 = vpop.f32.mrf.mxu0 }
 0x2e9   :  { %v5229_v46 = vadd.f32 %v3219_v29, %v5142_v19 }
 0x2ea   :  { %v3221_v2 = vpop.f32.mrf.mxu0 }
 0x2eb   :  { %v3222_v23 = vadd.f32 %v3221_v2, %v3220_v26  ;;  %2615 = vmax.xlane.f32.xlu1 %v5229_v46 }
 0x2ec   :  { %v3223_v5 = vpop.f32.mrf.mxu0 }
 0x2ed   :  { %v5233_v48 = vadd.f32 %v3222_v23, %v5142_v19 }
 0x2ee   :  { %v3224_v40 = vpop.f32.mrf.mxu0 }
 0x2ef   :  { %v3225_v22 = vadd.f32 %v3224_v40, %v3223_v5  ;;  %2617 = vmax.xlane.f32.xlu0 %v5233_v48 }
 0x2f0   :  { %v3226_v8 = vpop.f32.mrf.mxu0 }
 0x2f1   :  { %v5237_v37 = vadd.f32 %v3225_v22, %v5142_v19 }
 0x2f2   :  { %v3227_v50 = vpop.f32.mrf.mxu0 }
 0x2f3   :  { %v3228_v45 = vadd.f32 %v3227_v50, %v3226_v8  ;;  %2619 = vmax.xlane.f32.xlu1 %v5237_v37 }
 0x2f4   :  { %v3229_v3 = vpop.f32.mrf.mxu0 }
 0x2f5   :  { %v5241_v53 = vadd.f32 %v3228_v45, %v5142_v19 }
 0x2f6   :  { %v3230_v62 = vpop.f32.mrf.mxu0 }
 0x2f7   :  { %v3231_v10 = vadd.f32 %v3230_v62, %v3229_v3  ;;  %2621 = vmax.xlane.f32.xlu0 %v5241_v53 }
 0x2f8   :  { %v3232_v15 = vpop.f32.mrf.mxu0 }
 0x2f9   :  { %v5245_v63 = vadd.f32 %v3231_v10, %v5142_v19 }
 0x2fa   :  { %v3233_v61 = vpop.f32.mrf.mxu0 }
 0x2fb   :  { %v3234_v58 = vadd.f32 %v3233_v61, %v3232_v15  ;;  %2623 = vmax.xlane.f32.xlu1 %v5245_v63 }
 0x2fc   :  { %v3235_v6 = vpop.f32.mrf.mxu0 }
 0x2fd   :  { %v5249_v4 = vadd.f32 %v3234_v58, %v5142_v19 }
 0x2fe   :  { %v3236_v30 = vpop.f32.mrf.mxu0 }
 0x2ff   :  { %v3237_v32 = vadd.f32 %v3236_v30, %v3235_v6  ;;  %2625 = vmax.xlane.f32.xlu0 %v5249_v4 }
 0x300   :  { %v3238_v18 = vpop.f32.mrf.mxu0 }
 0x301   :  { %v5253_v51 = vadd.f32 %v3237_v32, %v5142_v19 }
 0x302   :  { %v3239_v39 = vpop.f32.mrf.mxu0 }
 0x303   :  { %v3240_v1 = vadd.f32 %v3239_v39, %v3238_v18  ;;  %2627 = vmax.xlane.f32.xlu1 %v5253_v51 }
 0x304   :  { %v3241_v60 = vpop.f32.mrf.mxu0 }
 0x305   :  { %v5257_v44 = vadd.f32 %v3240_v1, %v5142_v19 }
 0x306   :  { %v3242_v34 = vpop.f32.mrf.mxu0 }
 0x307   :  { %v3243_v41 = vadd.f32 %v3242_v34, %v3241_v60  ;;  %2629 = vmax.xlane.f32.xlu0 %v5257_v44 }
 0x308   :  { %v3244_v28 = vpop.f32.mrf.mxu0 }
 0x309   :  { %v5261_v14 = vadd.f32 %v3243_v41, %v5142_v19 }
 0x30a   :  { %v3245_v0 = vpop.f32.mrf.mxu0 }
 0x30b   :  { %v3246_v7 = vadd.f32 %v3245_v0, %v3244_v28  ;;  %2631 = vmax.xlane.f32.xlu1 %v5261_v14 }
 0x30c   :  { %v3247_v16 = vpop.f32.mrf.mxu0 }
 0x30d   :  { %v5265_v59 = vadd.f32 %v3246_v7, %v5142_v19 }
 0x30e   :  { %v3248_v42 = vpop.f32.mrf.mxu0 }
 0x30f   :  { %v3249_v11 = vadd.f32 %v3248_v42, %v3247_v16  ;;  %2633 = vmax.xlane.f32.xlu0 %v5265_v59 }
 0x311   :  { %v5269_v17 = vadd.f32 %v3249_v11, %v5142_v19 }
 0x313   :  { %2635 = vmax.xlane.f32.xlu1 %v5269_v17 }
 0x320   :  { %v2574_v29 = vpop.xlane.xlu0 %2573 }
 0x321   :  { %v2637_v26 = vsub.f32 %v5145_v31, %v2574_v29 }
 0x323   :  { %v2669_v2 = vmul.f32 1.442695, %v2637_v26 }
 0x324   :  { %v2576_v23 = vpop.xlane.xlu0 %2575 }
 0x325   :  { %3627 = vpow2.f32 %v2669_v2  ;;  %v2638_v5 = vsub.f32 %v5149_v9, %v2576_v23 }
 0x327   :  { %v2671_v40 = vmul.f32 1.442695, %v2638_v5 }
 0x328   :  { %v2578_v22 = vpop.xlane.xlu1 %2577 }
 0x329   :  { %3629 = vpow2.f32 %v2671_v40  ;;  %v2639_v8 = vsub.f32 %v5153_v57, %v2578_v22 }
 0x32b   :  { %v2673_v50 = vmul.f32 1.442695, %v2639_v8 }
 0x32c   :  { %v2580_v45 = vpop.xlane.xlu1 %2579 }
 0x32d   :  { %3631 = vpow2.f32 %v2673_v50  ;;  %v2640_v19 = vsub.f32 %v5157_v12, %v2580_v45 }
 0x32f   :  { %v2675_v3 = vmul.f32 1.442695, %v2640_v19 }
 0x330   :  { %v2582_v62 = vpop.xlane.xlu0 %2581 }
 0x331   :  { %3633 = vpow2.f32 %v2675_v3  ;;  %v2641_v31 = vsub.f32 %v5161_v49, %v2582_v62 }
 0x332   :  { %v5277_v10 = vpop.eup %3627 }
 0x333   :  { %v2677_v15 = vmul.f32 1.442695, %v2641_v31  ;;  %2733 = vadd.xlane.f32.xlu0 %v5277_v10 }
 0x334   :  { %v2584_v9 = vpop.xlane.xlu1 %2583 }
 0x335   :  { %3635 = vpow2.f32 %v2677_v15  ;;  %v2642_v61 = vsub.f32 %v5165_v13, %v2584_v9 }
 0x336   :  { %v5281_v57 = vpop.eup %3629 }
 0x337   :  { %v2679_v58 = vmul.f32 1.442695, %v2642_v61  ;;  %2735 = vadd.xlane.f32.xlu1 %v5281_v57 }
 0x338   :  { %v2586_v12 = vpop.xlane.xlu0 %2585 }
 0x339   :  { %3637 = vpow2.f32 %v2679_v58  ;;  %v2643_v6 = vsub.f32 %v5169_v20, %v2586_v12 }
 0x33a   :  { %v5285_v30 = vpop.eup %3631 }
 0x33b   :  { %v2681_v49 = vmul.f32 1.442695, %v2643_v6  ;;  %2737 = vadd.xlane.f32.xlu0 %v5285_v30 }
 0x33c   :  { %v2588_v32 = vpop.xlane.xlu1 %2587 }
 0x33d   :  { %3639 = vpow2.f32 %v2681_v49  ;;  %v2644_v18 = vsub.f32 %v5173_v21, %v2588_v32 }
 0x33e   :  { %v5289_v39 = vpop.eup %3633 }
 0x33f   :  { %v2683_v13 = vmul.f32 1.442695, %v2644_v18  ;;  %2739 = vadd.xlane.f32.xlu1 %v5289_v39 }
 0x340   :  { %v2590_v1 = vpop.xlane.xlu0 %2589 }
 0x341   :  { %3641 = vpow2.f32 %v2683_v13  ;;  %v2645_v60 = vsub.f32 %v5177_v47, %v2590_v1 }
 0x342   :  { %v5293_v34 = vpop.eup %3635 }
 0x343   :  { %v2685_v20 = vmul.f32 1.442695, %v2645_v60  ;;  %2741 = vadd.xlane.f32.xlu0 %v5293_v34 }
 0x344   :  { %v2592_v41 = vpop.xlane.xlu1 %2591 }
 0x345   :  { %3643 = vpow2.f32 %v2685_v20  ;;  %v2646_v28 = vsub.f32 %v5181_v38, %v2592_v41 }
 0x346   :  { %v5297_v0 = vpop.eup %3637 }
 0x347   :  { %v2687_v21 = vmul.f32 1.442695, %v2646_v28  ;;  %2743 = vadd.xlane.f32.xlu1 %v5297_v0 }
 0x348   :  { %v2594_v7 = vpop.xlane.xlu0 %2593 }
 0x349   :  { %3645 = vpow2.f32 %v2687_v21  ;;  %v2647_v16 = vsub.f32 %v5185_v25, %v2594_v7 }
 0x34a   :  { %v5301_v42 = vpop.eup %3639 }
 0x34b   :  { %v2689_v47 = vmul.f32 1.442695, %v2647_v16  ;;  %2745 = vadd.xlane.f32.xlu0 %v5301_v42 }
 0x34c   :  { %v2596_v11 = vpop.xlane.xlu1 %2595 }
 0x34d   :  { %3647 = vpow2.f32 %v2689_v47  ;;  %v2648_v29 = vsub.f32 %v5189_v24, %v2596_v11 }
 0x34e   :  { %v5305_v26 = vpop.eup %3641 }
 0x34f   :  { %v2691_v38 = vmul.f32 1.442695, %v2648_v29  ;;  %2747 = vadd.xlane.f32.xlu1 %v5305_v26 }
 0x350   :  { %v2598_v2 = vpop.xlane.xlu0 %2597 }
 0x351   :  { %3649 = vpow2.f32 %v2691_v38  ;;  %v2649_v23 = vsub.f32 %v5193_v55, %v2598_v2 }
 0x352   :  { %v5309_v5 = vpop.eup %3643 }
 0x353   :  { %v2693_v25 = vmul.f32 1.442695, %v2649_v23  ;;  %2749 = vadd.xlane.f32.xlu0 %v5309_v5 }
 0x354   :  { %v2600_v40 = vpop.xlane.xlu1 %2599 }
 0x355   :  { %3651 = vpow2.f32 %v2693_v25  ;;  %v2650_v22 = vsub.f32 %v5197_v27, %v2600_v40 }
 0x356   :  { %v5313_v8 = vpop.eup %3645 }
 0x357   :  { %v2695_v24 = vmul.f32 1.442695, %v2650_v22  ;;  %2751 = vadd.xlane.f32.xlu1 %v5313_v8 }
 0x358   :  { %v2602_v50 = vpop.xlane.xlu0 %2601 }
 0x359   :  { %3653 = vpow2.f32 %v2695_v24  ;;  %v2651_v45 = vsub.f32 %v5201_v56, %v2602_v50 }
 0x35a   :  { %v5317_v19 = vpop.eup %3647 }
 0x35b   :  { %v2697_v55 = vmul.f32 1.442695, %v2651_v45  ;;  %2753 = vadd.xlane.f32.xlu0 %v5317_v19 }
 0x35c   :  { %v2604_v3 = vpop.xlane.xlu1 %2603 }
 0x35d   :  { %3655 = vpow2.f32 %v2697_v55  ;;  %v2652_v62 = vsub.f32 %v5205_v54, %v2604_v3 }
 0x35e   :  { %v5321_v31 = vpop.eup %3649 }
 0x35f   :  { %v2699_v27 = vmul.f32 1.442695, %v2652_v62  ;;  %2755 = vadd.xlane.f32.xlu1 %v5321_v31 }
 0x360   :  { %v2606_v15 = vpop.xlane.xlu0 %2605 }
 0x361   :  { %3657 = vpow2.f32 %v2699_v27  ;;  %v2653_v9 = vsub.f32 %v5209_v33, %v2606_v15 }
 0x362   :  { %v5325_v61 = vpop.eup %3651 }
 0x363   :  { %v2701_v56 = vmul.f32 1.442695, %v2653_v9  ;;  %2757 = vadd.xlane.f32.xlu0 %v5325_v61 }
 0x364   :  { %v2608_v58 = vpop.xlane.xlu1 %2607 }
 0x365   :  { %3659 = vpow2.f32 %v2701_v56  ;;  %v2654_v12 = vsub.f32 %v5213_v35, %v2608_v58 }
 0x366   :  { %v5329_v6 = vpop.eup %3653 }
 0x367   :  { %v2703_v54 = vmul.f32 1.442695, %v2654_v12  ;;  %2759 = vadd.xlane.f32.xlu1 %v5329_v6 }
 0x368   :  { %v2610_v49 = vpop.xlane.xlu0 %2609 }
 0x369   :  { %3661 = vpow2.f32 %v2703_v54  ;;  %v2655_v32 = vsub.f32 %v5217_v52, %v2610_v49 }
 0x36a   :  { %v5333_v18 = vpop.eup %3655 }
 0x36b   :  { %v2705_v33 = vmul.f32 1.442695, %v2655_v32  ;;  %2761 = vadd.xlane.f32.xlu0 %v5333_v18 }
 0x36c   :  { %v2612_v13 = vpop.xlane.xlu1 %2611 }
 0x36d   :  { %3663 = vpow2.f32 %v2705_v33  ;;  %v2656_v1 = vsub.f32 %v5221_v43, %v2612_v13 }
 0x36e   :  { %v5337_v60 = vpop.eup %3657 }
 0x36f   :  { %v2707_v35 = vmul.f32 1.442695, %v2656_v1  ;;  %2763 = vadd.xlane.f32.xlu1 %v5337_v60 }
 0x370   :  { %v2614_v20 = vpop.xlane.xlu0 %2613 }
 0x371   :  { %3665 = vpow2.f32 %v2707_v35  ;;  %v2657_v41 = vsub.f32 %v5225_v36, %v2614_v20 }
 0x372   :  { %v5341_v28 = vpop.eup %3659 }
 0x373   :  { %v2709_v52 = vmul.f32 1.442695, %v2657_v41  ;;  %2765 = vadd.xlane.f32.xlu0 %v5341_v28 }
 0x374   :  { %v2616_v21 = vpop.xlane.xlu1 %2615 }
 0x375   :  { %3667 = vpow2.f32 %v2709_v52  ;;  %v2658_v7 = vsub.f32 %v5229_v46, %v2616_v21 }
 0x376   :  { %v5345_v16 = vpop.eup %3661 }
 0x377   :  { %v2711_v43 = vmul.f32 1.442695, %v2658_v7  ;;  %2767 = vadd.xlane.f32.xlu1 %v5345_v16 }
 0x378   :  { %v2618_v47 = vpop.xlane.xlu0 %2617 }
 0x379   :  { %3669 = vpow2.f32 %v2711_v43  ;;  %v2659_v11 = vsub.f32 %v5233_v48, %v2618_v47 }
 0x37a   :  { %v5349_v29 = vpop.eup %3663 }
 0x37b   :  { %v2713_v36 = vmul.f32 1.442695, %v2659_v11  ;;  %2769 = vadd.xlane.f32.xlu0 %v5349_v29 }
 0x37c   :  { %v2620_v38 = vpop.xlane.xlu1 %2619 }
 0x37d   :  { %3671 = vpow2.f32 %v2713_v36  ;;  %v2660_v2 = vsub.f32 %v5237_v37, %v2620_v38 }
 0x37e   :  { %v5353_v23 = vpop.eup %3665 }
 0x37f   :  { %v2715_v46 = vmul.f32 1.442695, %v2660_v2  ;;  %2771 = vadd.xlane.f32.xlu1 %v5353_v23 }
 0x380   :  { %v2622_v25 = vpop.xlane.xlu0 %2621 }
 0x381   :  { %3673 = vpow2.f32 %v2715_v46  ;;  %v2661_v40 = vsub.f32 %v5241_v53, %v2622_v25 }
 0x382   :  { %v5357_v22 = vpop.eup %3667 }
 0x383   :  { %v2717_v48 = vmul.f32 1.442695, %v2661_v40  ;;  %2773 = vadd.xlane.f32.xlu0 %v5357_v22 }
 0x384   :  { %v2624_v24 = vpop.xlane.xlu1 %2623 }
 0x385   :  { %3675 = vpow2.f32 %v2717_v48  ;;  %v2662_v50 = vsub.f32 %v5245_v63, %v2624_v24 }
 0x386   :  { %v5361_v45 = vpop.eup %3669 }
 0x387   :  { %v2719_v37 = vmul.f32 1.442695, %v2662_v50  ;;  %2775 = vadd.xlane.f32.xlu1 %v5361_v45 }
 0x388   :  { %v2626_v55 = vpop.xlane.xlu0 %2625 }
 0x389   :  { %3677 = vpow2.f32 %v2719_v37  ;;  %v2663_v3 = vsub.f32 %v5249_v4, %v2626_v55 }
 0x38a   :  { %v5365_v62 = vpop.eup %3671 }
 0x38b   :  { %v2721_v53 = vmul.f32 1.442695, %v2663_v3  ;;  %2777 = vadd.xlane.f32.xlu0 %v5365_v62 }
 0x38c   :  { %v2628_v27 = vpop.xlane.xlu1 %2627 }
 0x38d   :  { %3679 = vpow2.f32 %v2721_v53  ;;  %v2664_v15 = vsub.f32 %v5253_v51, %v2628_v27 }
 0x38e   :  { %v5369_v9 = vpop.eup %3673 }
 0x38f   :  { %v2723_v63 = vmul.f32 1.442695, %v2664_v15  ;;  %2779 = vadd.xlane.f32.xlu1 %v5369_v9 }
 0x390   :  { %v2630_v56 = vpop.xlane.xlu0 %2629 }
 0x391   :  { %3681 = vpow2.f32 %v2723_v63  ;;  %v2665_v58 = vsub.f32 %v5257_v44, %v2630_v56 }
 0x392   :  { %v5373_v12 = vpop.eup %3675 }
 0x393   :  { %v2725_v4 = vmul.f32 1.442695, %v2665_v58  ;;  %2781 = vadd.xlane.f32.xlu0 %v5373_v12 }
 0x394   :  { %v2632_v54 = vpop.xlane.xlu1 %2631 }
 0x395   :  { %3683 = vpow2.f32 %v2725_v4  ;;  %v2666_v49 = vsub.f32 %v5261_v14, %v2632_v54 }
 0x396   :  { %v5377_v32 = vpop.eup %3677 }
 0x397   :  { %v2727_v51 = vmul.f32 1.442695, %v2666_v49  ;;  %2783 = vadd.xlane.f32.xlu1 %v5377_v32 }
 0x398   :  { %v2634_v33 = vpop.xlane.xlu0 %2633 }
 0x399   :  { %3685 = vpow2.f32 %v2727_v51  ;;  %v2667_v13 = vsub.f32 %v5265_v59, %v2634_v33 }
 0x39a   :  { %v5381_v1 = vpop.eup %3679 }
 0x39b   :  { %v2729_v44 = vmul.f32 1.442695, %v2667_v13  ;;  %2785 = vadd.xlane.f32.xlu0 %v5381_v1 }
 0x39c   :  { %v2636_v35 = vpop.xlane.xlu1 %2635 }
 0x39d   :  { %3687 = vpow2.f32 %v2729_v44  ;;  %v2668_v20 = vsub.f32 %v5269_v17, %v2636_v35 }
 0x39e   :  { %v5385_v41 = vpop.eup %3681 }
 0x39f   :  { %v2731_v14 = vmul.f32 1.442695, %v2668_v20  ;;  %2787 = vadd.xlane.f32.xlu1 %v5385_v41 }
 0x3a1   :  { %3689 = vpow2.f32 %v2731_v14 }
 0x3a2   :  { %v5388_v52 = vpop.eup %3683 }
 0x3a3   :  { %2789 = vadd.xlane.f32.xlu0 %v5388_v52 }
 0x3a6   :  { %v5391_v59 = vpop.eup %3685 }
 0x3a7   :  { %2791 = vadd.xlane.f32.xlu1 %v5391_v59 }
 0x3aa   :  { %v5394_v21 = vpop.eup %3687 }
 0x3ab   :  { %2793 = vadd.xlane.f32.xlu0 %v5394_v21 }
 0x3ae   :  { %v5397_v7 = vpop.eup %3689 }
 0x3af   :  { %2795 = vadd.xlane.f32.xlu1 %v5397_v7 }
 0x3bc   :  { %v2734_v17 = vpop.xlane.xlu0 %2733 }
 0x3bd   :  { %3691 = vrcp.f32 %v2734_v17 }
 0x3c0   :  { %v2736_v43 = vpop.xlane.xlu1 %2735 }
 0x3c1   :  { %3693 = vrcp.f32 %v2736_v43 }
 0x3c4   :  { %v2738_v47 = vpop.xlane.xlu0 %2737 }
 0x3c5   :  { %3695 = vrcp.f32 %v2738_v47 }
 0x3c8   :  { %v2740_v11 = vpop.xlane.xlu1 %2739 }
 0x3c9   :  { %3697 = vrcp.f32 %v2740_v11 }
 0x3ca   :  { %v3692_v36 = vpop.eup %3691 }
 0x3cb   :  { %v2829_v38 = vmul.f32 %v3692_v36, %v5277_v10 }
 0x3cc   :  { %v2742_v2 = vpop.xlane.xlu0 %2741 }
 0x3cd   :  { %2861 = vst [vmem:[%s5533_s5] sm:$0xff] %v2829_v38  ;;  %3699 = vrcp.f32 %v2742_v2 }
 0x3ce   :  { %v3694_v46 = vpop.eup %3693 }
 0x3cf   :  { %v2830_v25 = vmul.f32 %v3694_v46, %v5281_v57 }
 0x3d0   :  { %v2744_v40 = vpop.xlane.xlu1 %2743 }
 0x3d1   :  { %2862 = vst [vmem:[%s5533_s5 + $0x8] sm:$0xff] %v2830_v25  ;;  %3701 = vrcp.f32 %v2744_v40 }
 0x3d2   :  { %v3696_v48 = vpop.eup %3695 }
 0x3d3   :  { %v2831_v24 = vmul.f32 %v3696_v48, %v5285_v30 }
 0x3d4   :  { %v2746_v50 = vpop.xlane.xlu0 %2745 }
 0x3d5   :  { %2863 = vst [vmem:[%s5533_s5 + $0x10] sm:$0xff] %v2831_v24  ;;  %3703 = vrcp.f32 %v2746_v50 }
 0x3d6   :  { %v3698_v10 = vpop.eup %3697 }
 0x3d7   :  { %v2832_v37 = vmul.f32 %v3698_v10, %v5289_v39 }
 0x3d8   :  { %v2748_v55 = vpop.xlane.xlu1 %2747 }
 0x3d9   :  { %2864 = vst [vmem:[%s5533_s5 + $0x18] sm:$0xff] %v2832_v37  ;;  %3705 = vrcp.f32 %v2748_v55 }
 0x3da   :  { %v3700_v57 = vpop.eup %3699 }
 0x3db   :  { %v2833_v3 = vmul.f32 %v3700_v57, %v5293_v34 }
 0x3dc   :  { %v2750_v53 = vpop.xlane.xlu0 %2749 }
 0x3dd   :  { %2865 = vst [vmem:[%s5533_s5 + $0x20] sm:$0xff] %v2833_v3  ;;  %3707 = vrcp.f32 %v2750_v53 }
 0x3de   :  { %v3702_v30 = vpop.eup %3701 }
 0x3df   :  { %v2834_v27 = vmul.f32 %v3702_v30, %v5297_v0 }
 0x3e0   :  { %v2752_v15 = vpop.xlane.xlu1 %2751 }
 0x3e1   :  { %2866 = vst [vmem:[%s5533_s5 + $0x28] sm:$0xff] %v2834_v27  ;;  %3709 = vrcp.f32 %v2752_v15 }
 0x3e2   :  { %v3704_v39 = vpop.eup %3703 }
 0x3e3   :  { %v2835_v63 = vmul.f32 %v3704_v39, %v5301_v42 }
 0x3e4   :  { %v2754_v56 = vpop.xlane.xlu0 %2753 }
 0x3e5   :  { %2867 = vst [vmem:[%s5533_s5 + $0x30] sm:$0xff] %v2835_v63  ;;  %3711 = vrcp.f32 %v2754_v56 }
 0x3e6   :  { %v3706_v34 = vpop.eup %3705 }
 0x3e7   :  { %v2836_v58 = vmul.f32 %v3706_v34, %v5305_v26 }
 0x3e8   :  { %v2756_v4 = vpop.xlane.xlu1 %2755 }
 0x3e9   :  { %2868 = vst [vmem:[%s5533_s5 + $0x38] sm:$0xff] %v2836_v58  ;;  %3713 = vrcp.f32 %v2756_v4 }
 0x3ea   :  { %v3708_v0 = vpop.eup %3707 }
 0x3eb   :  { %v2837_v54 = vmul.f32 %v3708_v0, %v5309_v5 }
 0x3ec   :  { %v2758_v49 = vpop.xlane.xlu0 %2757 }
 0x3ed   :  { %2869 = vst [vmem:[%s5533_s5 + $0x40] sm:$0xff] %v2837_v54  ;;  %3715 = vrcp.f32 %v2758_v49 }
 0x3ee   :  { %v3710_v42 = vpop.eup %3709 }
 0x3ef   :  { %v2838_v51 = vmul.f32 %v3710_v42, %v5313_v8 }
 0x3f0   :  { %v2760_v33 = vpop.xlane.xlu1 %2759 }
 0x3f1   :  { %2870 = vst [vmem:[%s5533_s5 + $0x48] sm:$0xff] %v2838_v51  ;;  %3717 = vrcp.f32 %v2760_v33 }
 0x3f2   :  { %v3712_v26 = vpop.eup %3711 }
 0x3f3   :  { %v2839_v13 = vmul.f32 %v3712_v26, %v5317_v19 }
 0x3f4   :  { %v2762_v44 = vpop.xlane.xlu0 %2761 }
 0x3f5   :  { %2871 = vst [vmem:[%s5533_s5 + $0x50] sm:$0xff] %v2839_v13  ;;  %3719 = vrcp.f32 %v2762_v44 }
 0x3f6   :  { %v3714_v5 = vpop.eup %3713 }
 0x3f7   :  { %v2840_v35 = vmul.f32 %v3714_v5, %v5321_v31 }
 0x3f8   :  { %v2764_v20 = vpop.xlane.xlu1 %2763 }
 0x3f9   :  { %2872 = vst [vmem:[%s5533_s5 + $0x58] sm:$0xff] %v2840_v35  ;;  %3721 = vrcp.f32 %v2764_v20 }
 0x3fa   :  { %v3716_v8 = vpop.eup %3715 }
 0x3fb   :  { %v2841_v14 = vmul.f32 %v3716_v8, %v5325_v61 }
 0x3fc   :  { %v2766_v17 = vpop.xlane.xlu0 %2765 }
 0x3fd   :  { %2873 = vst [vmem:[%s5533_s5 + $0x60] sm:$0xff] %v2841_v14  ;;  %3723 = vrcp.f32 %v2766_v17 }
 0x3fe   :  { %v3718_v19 = vpop.eup %3717 }
 0x3ff   :  { %v2842_v43 = vmul.f32 %v3718_v19, %v5329_v6 }
 0x400   :  { %v2768_v47 = vpop.xlane.xlu1 %2767 }
 0x401   :  { %2874 = vst [vmem:[%s5533_s5 + $0x68] sm:$0xff] %v2842_v43  ;;  %3725 = vrcp.f32 %v2768_v47 }
 0x402   :  { %v3720_v31 = vpop.eup %3719 }
 0x403   :  { %v2843_v11 = vmul.f32 %v3720_v31, %v5333_v18 }
 0x404   :  { %v2770_v36 = vpop.xlane.xlu0 %2769 }
 0x405   :  { %2875 = vst [vmem:[%s5533_s5 + $0x70] sm:$0xff] %v2843_v11  ;;  %3727 = vrcp.f32 %v2770_v36 }
 0x406   :  { %v3722_v61 = vpop.eup %3721 }
 0x407   :  { %v2844_v38 = vmul.f32 %v3722_v61, %v5337_v60 }
 0x408   :  { %v2772_v2 = vpop.xlane.xlu1 %2771 }
 0x409   :  { %2876 = vst [vmem:[%s5533_s5 + $0x78] sm:$0xff] %v2844_v38  ;;  %3729 = vrcp.f32 %v2772_v2 }
 0x40a   :  { %v3724_v6 = vpop.eup %3723 }
 0x40b   :  { %v2845_v46 = vmul.f32 %v3724_v6, %v5341_v28 }
 0x40c   :  { %v2774_v25 = vpop.xlane.xlu0 %2773 }
 0x40d   :  { %2877 = vst [vmem:[%s5533_s5 + $0x80] sm:$0xff] %v2845_v46  ;;  %3731 = vrcp.f32 %v2774_v25 }
 0x40e   :  { %v3726_v18 = vpop.eup %3725 }
 0x40f   :  { %v2846_v40 = vmul.f32 %v3726_v18, %v5345_v16 }
 0x410   :  { %v2776_v48 = vpop.xlane.xlu1 %2775 }
 0x411   :  { %2878 = vst [vmem:[%s5533_s5 + $0x88] sm:$0xff] %v2846_v40  ;;  %3733 = vrcp.f32 %v2776_v48 }
 0x412   :  { %v3728_v60 = vpop.eup %3727 }
 0x413   :  { %v2847_v24 = vmul.f32 %v3728_v60, %v5349_v29 }
 0x414   :  { %v2778_v50 = vpop.xlane.xlu0 %2777 }
 0x415   :  { %2879 = vst [vmem:[%s5533_s5 + $0x90] sm:$0xff] %v2847_v24  ;;  %3735 = vrcp.f32 %v2778_v50 }
 0x416   :  { %v3730_v28 = vpop.eup %3729 }
 0x417   :  { %v2848_v10 = vmul.f32 %v3730_v28, %v5353_v23 }
 0x418   :  { %v2780_v37 = vpop.xlane.xlu1 %2779 }
 0x419   :  { %2880 = vst [vmem:[%s5533_s5 + $0x98] sm:$0xff] %v2848_v10  ;;  %3737 = vrcp.f32 %v2780_v37 }
 0x41a   :  { %v3732_v16 = vpop.eup %3731 }
 0x41b   :  { %v2849_v55 = vmul.f32 %v3732_v16, %v5357_v22 }
 0x41c   :  { %v2782_v57 = vpop.xlane.xlu0 %2781 }
 0x41d   :  { %2881 = vst [vmem:[%s5533_s5 + $0xa0] sm:$0xff] %v2849_v55  ;;  %3739 = vrcp.f32 %v2782_v57 }
 0x41e   :  { %v3734_v29 = vpop.eup %3733 }
 0x41f   :  { %v2850_v3 = vmul.f32 %v3734_v29, %v5361_v45 }
 0x420   :  { %v2784_v53 = vpop.xlane.xlu1 %2783 }
 0x421   :  { %2882 = vst [vmem:[%s5533_s5 + $0xa8] sm:$0xff] %v2850_v3  ;;  %3741 = vrcp.f32 %v2784_v53 }
 0x422   :  { %v3736_v23 = vpop.eup %3735 }
 0x423   :  { %v2851_v30 = vmul.f32 %v3736_v23, %v5365_v62 }
 0x424   :  { %v2786_v27 = vpop.xlane.xlu0 %2785 }
 0x425   :  { %2883 = vst [vmem:[%s5533_s5 + $0xb0] sm:$0xff] %v2851_v30  ;;  %3743 = vrcp.f32 %v2786_v27 }
 0x426   :  { %v3738_v22 = vpop.eup %3737 }
 0x427   :  { %v2852_v15 = vmul.f32 %v3738_v22, %v5369_v9 }
 0x428   :  { %v2788_v39 = vpop.xlane.xlu1 %2787 }
 0x429   :  { %2884 = vst [vmem:[%s5533_s5 + $0xb8] sm:$0xff] %v2852_v15  ;;  %3745 = vrcp.f32 %v2788_v39 }
 0x42a   :  { %v3740_v45 = vpop.eup %3739 }
 0x42b   :  { %v2853_v63 = vmul.f32 %v3740_v45, %v5373_v12 }
 0x42c   :  { %v2790_v56 = vpop.xlane.xlu0 %2789 }
 0x42d   :  { %2885 = vst [vmem:[%s5533_s5 + $0xc0] sm:$0xff] %v2853_v63  ;;  %3747 = vrcp.f32 %v2790_v56 }
 0x42e   :  { %v3742_v62 = vpop.eup %3741 }
 0x42f   :  { %v2854_v34 = vmul.f32 %v3742_v62, %v5377_v32 }
 0x430   :  { %v2792_v58 = vpop.xlane.xlu1 %2791 }
 0x431   :  { %2886 = vst [vmem:[%s5533_s5 + $0xc8] sm:$0xff] %v2854_v34  ;;  %3749 = vrcp.f32 %v2792_v58 }
 0x432   :  { %v3744_v9 = vpop.eup %3743 }
 0x433   :  { %v2855_v4 = vmul.f32 %v3744_v9, %v5381_v1 }
 0x434   :  { %v2794_v0 = vpop.xlane.xlu0 %2793 }
 0x435   :  { %2887 = vst [vmem:[%s5533_s5 + $0xd0] sm:$0xff] %v2855_v4  ;;  %3751 = vrcp.f32 %v2794_v0 }
 0x436   :  { %v3746_v12 = vpop.eup %3745 }
 0x437   :  { %v2856_v54 = vmul.f32 %v3746_v12, %v5385_v41 }
 0x438   :  { %v2796_v49 = vpop.xlane.xlu1 %2795 }
 0x439   :  { %2888 = vst [vmem:[%s5533_s5 + $0xd8] sm:$0xff] %v2856_v54  ;;  %3753 = vrcp.f32 %v2796_v49 }
 0x43a   :  { %v3748_v32 = vpop.eup %3747 }
 0x43b   :  { %v2857_v42 = vmul.f32 %v3748_v32, %v5388_v52 }
 0x43d   :  { %2889 = vst [vmem:[%s5533_s5 + $0xe0] sm:$0xff] %v2857_v42 }
 0x43e   :  { %v3750_v1 = vpop.eup %3749 }
 0x43f   :  { %v2858_v51 = vmul.f32 %v3750_v1, %v5391_v59 }
 0x441   :  { %2890 = vst [vmem:[%s5533_s5 + $0xe8] sm:$0xff] %v2858_v51 }
 0x442   :  { %v3752_v41 = vpop.eup %3751 }
 0x443   :  { %v2859_v33 = vmul.f32 %v3752_v41, %v5394_v21 }
 0x445   :  { %2891 = vst [vmem:[%s5533_s5 + $0xf0] sm:$0xff] %v2859_v33 }
 0x446   :  { %v3754_v26 = vpop.eup %3753 }
 0x447   :  { %v2860_v52 = vmul.f32 %v3754_v26, %v5397_v7 }
 0x449   :  { %2892 = vst [vmem:[%s5533_s5 + $0xf8] sm:$0xff] %v2860_v52 }

</bundles_post_ra>
